<compile_context>
chip_gen: v5e
topology: v5e:2x2
jax: 0.10.0
libtpu: 0.0.40
codegen_flags: <defaults>
</compile_context>

<pallas_src>
import math
import functools

import jax
import jax.numpy as jnp
from jax import lax
from jax.experimental import pallas as pl
from jax.experimental.pallas import tpu as pltpu


def _decoder_layer_kernel(
    src_ref, mem_ref, pe_ref,
    wqkv1_ref, bqkv1_ref, wo1_ref, bo1_ref,
    wq2_ref, bq2_ref, wkv2_ref, bkv2_ref, wo2_ref, bo2_ref,
    out_ref,
    *, B, S, T, nhead, head_dim, eps,
):
    E = src_ref.shape[-1]
    hd = head_dim
    scale = 1.0 / math.sqrt(hd)

    # 1. positional encoding (pe pre-tiled to (B*S, E) at pack time)
    x = src_ref[...] + pe_ref[...]                              # (B*S, E)

    def attend(q, k, v, Lq, Lk):
        """Per-(batch, head) softmax attention on flat (B*L, E) q/k/v (SSA values,
        no scratch). Heads are re-concatenated so the output projection outside
        this function is ONE (B*Lq, E) @ (E, E) matmul."""
        batch_rows = []
        for b in range(B):
            qb = q[b * Lq:(b + 1) * Lq, :]
            kb = k[b * Lk:(b + 1) * Lk, :]
            vb = v[b * Lk:(b + 1) * Lk, :]
            heads = []
            for h in range(nhead):
                lo, hi = h * hd, (h + 1) * hd
                s = lax.dot_general(qb[:, lo:hi], kb[:, lo:hi],
                                    (((1,), (1,)), ((), ())),
                                    preferred_element_type=jnp.float32) * scale
                s = s - jnp.max(s, axis=-1, keepdims=True)
                p = jnp.exp(s)
                # NOTE: pl.reciprocal(..., approx=True) is the cheaper EUP path,
                # but exact division is kept to guarantee the 1e-3 reference check.
                p = p / jnp.sum(p, axis=-1, keepdims=True)
                heads.append(jnp.dot(p, vb[:, lo:hi],
                                     preferred_element_type=jnp.float32))
            batch_rows.append(jnp.concatenate(heads, axis=-1))  # (Lq, E)
        return jnp.concatenate(batch_rows, axis=0)              # (B*Lq, E)

    # 2. self-attention: fused QKV projection (one matmul) + single output proj.
    qkv = jnp.dot(x, wqkv1_ref[...],
                  preferred_element_type=jnp.float32) + bqkv1_ref[...]
    q1, k1, v1 = qkv[:, :E], qkv[:, E:2 * E], qkv[:, 2 * E:]
    ctx1 = attend(q1, k1, v1, S, S)
    sa = jnp.dot(ctx1, wo1_ref[...],
                 preferred_element_type=jnp.float32) + bo1_ref[...]

    # 3. residual + BatchNorm1d (channel = batch index, biased stats over (S, E))
    y = x + sa
    blocks = []
    for b in range(B):
        yb = y[b * S:(b + 1) * S, :]
        mu = jnp.mean(yb)
        var = jnp.mean((yb - mu) * (yb - mu))
        blocks.append((yb - mu) * lax.rsqrt(var + eps))
    yn = jnp.concatenate(blocks, axis=0)                        # (B*S, E)

    # 4. cross-attention: query = memory, key/value = normalized src (fused KV proj)
    mem = mem_ref[...]                                          # (B*T, E)
    q2 = jnp.dot(mem, wq2_ref[...],
                 preferred_element_type=jnp.float32) + bq2_ref[...]
    kv = jnp.dot(yn, wkv2_ref[...],
                 preferred_element_type=jnp.float32) + bkv2_ref[...]
    k2, v2 = kv[:, :E], kv[:, E:]
    ctx2 = attend(q2, k2, v2, T, S)
    out_ref[...] = jnp.dot(ctx2, wo2_ref[...],
                           preferred_element_type=jnp.float32) + bo2_ref[...]


def pack_params(params, *, S, B):
    """One-time packing (hoisted out of the per-call path): transposed / fused
    projection weights and batch-tiled positional encoding."""
    sa, ca = params['self_attn'], params['cross_attn']
    E = sa['out_w'].shape[0]
    pe = params['pe']
    assert S <= pe.shape[0], (
        f"sequence length {S} exceeds positional-encoding table {pe.shape[0]}")
    return dict(
        pe=jnp.tile(pe[:S], (B, 1)),                       # (B*S, E)
        wqkv1=sa['in_w'].T,                                # (E, 3E) = [Wq^T|Wk^T|Wv^T]
        bqkv1=sa['in_b'].reshape(1, 3 * E),
        wo1=sa['out_w'].T, bo1=sa['out_b'].reshape(1, E),
        wq2=ca['in_w'][:E].T, bq2=ca['in_b'][:E].reshape(1, E),
        wkv2=ca['in_w'][E:].T,                             # (E, 2E) = [Wk^T|Wv^T]
        bkv2=ca['in_b'][E:].reshape(1, 2 * E),
        wo2=ca['out_w'].T, bo2=ca['out_b'].reshape(1, E),
    )


def transformer_decoder_layer(src, memory, packed, nhead, eps=1e-5):
    """src: (S, B, E), memory: (T, B, E) in PyTorch (L, N, E) layout."""
    S, B, E = src.shape
    T = memory.shape[0]
    hd = E // nhead

    # Flatten batch into the row (sublane) axis: one kernel invocation, no grid.
    src_flat = jnp.transpose(src, (1, 0, 2)).reshape(B * S, E)
    mem_flat = jnp.transpose(memory, (1, 0, 2)).reshape(B * T, E)

    inputs = [src_flat, mem_flat, packed['pe'],
              packed['wqkv1'], packed['bqkv1'], packed['wo1'], packed['bo1'],
              packed['wq2'], packed['bq2'], packed['wkv2'], packed['bkv2'],
              packed['wo2'], packed['bo2']]

    kernel = functools.partial(_decoder_layer_kernel, B=B, S=S, T=T,
                               nhead=nhead, head_dim=hd, eps=eps)

    out_flat = pl.pallas_call(
        kernel,
        out_shape=jax.ShapeDtypeStruct((B * T, E), jnp.float32),
        in_specs=[pl.BlockSpec(memory_space=pltpu.MemorySpace.VMEM)
                  for _ in inputs],
        out_specs=pl.BlockSpec(memory_space=pltpu.MemorySpace.VMEM),
    )(*inputs)

    return jnp.transpose(out_flat.reshape(B, T, E), (1, 0, 2))  # (T, B, E)


def init_params(key, d_model, max_len):
    E = d_model
    k_self, k_cross = jax.random.split(key, 2)

    def mha_params(k):
        k1, k2, k3, k4 = jax.random.split(k, 4)
        return dict(
            in_w=jax.random.normal(k1, (3 * E, E), jnp.float32) / math.sqrt(E),
            in_b=jax.random.normal(k2, (3 * E,), jnp.float32) * 0.02,
            out_w=jax.random.normal(k3, (E, E), jnp.float32) / math.sqrt(E),
            out_b=jax.random.normal(k4, (E,), jnp.float32) * 0.02,
        )

    # PositionalEncoding buffer of the (modified) module: pe = sin(p*d) + cos(p*d)
    position = jnp.arange(max_len, dtype=jnp.float32)[:, None]
    div_term = jnp.exp(jnp.arange(E, dtype=jnp.float32) * (-math.log(10000.0) / E))
    pe = jnp.sin(position * div_term) + jnp.cos(position * div_term)  # (max_len, E)

    return dict(self_attn=mha_params(k_self), cross_attn=mha_params(k_cross), pe=pe)


def reference_forward(src, memory, params, nhead, eps=1e-5):
    """Pure-JAX reference matching the PyTorch forward (eval / p=0 dropouts)."""
    S, B, E = src.shape
    hd = E // nhead
    x = src + params['pe'][:S][:, None, :]

    def mha(q_in, kv_in, p):
        wq, wk, wv = p['in_w'][:E], p['in_w'][E:2 * E], p['in_w'][2 * E:]
        bq, bk, bv = p['in_b'][:E], p['in_b'][E:2 * E], p['in_b'][2 * E:]
        Lq, Lk = q_in.shape[0], kv_in.shape[0]
        q = q_in @ wq.T + bq
        k = kv_in @ wk.T + bk
        v = kv_in @ wv.T + bv
        qh = q.reshape(Lq, B, nhead, hd).transpose(1, 2, 0, 3)
        kh = k.reshape(Lk, B, nhead, hd).transpose(1, 2, 0, 3)
        vh = v.reshape(Lk, B, nhead, hd).transpose(1, 2, 0, 3)
        s = jnp.einsum('bhqd,bhkd->bhqk', qh, kh) / math.sqrt(hd)
        a = jax.nn.softmax(s, axis=-1)
        o = jnp.einsum('bhqk,bhkd->bhqd', a, vh)
        o = o.transpose(2, 0, 1, 3).reshape(Lq, B, E)
        return o @ p['out_w'].T + p['out_b']

    sa = mha(x, x, params['self_attn'])
    y = x + sa
    mu = jnp.mean(y, axis=(0, 2), keepdims=True)
    var = jnp.mean((y - mu) ** 2, axis=(0, 2), keepdims=True)
    yn = (y - mu) / jnp.sqrt(var + eps)
    return mha(memory, yn, params['cross_attn'])


if __name__ == "__main__":
    # TODO(synk): linear1/linear2/activation/sigmoid/create_mask are unused by this
    # module's forward and therefore not implemented; all dropouts are identity
    # (p=0 layer dropouts; pos-encoder dropout treated as eval-mode).
    config = {'feat': 16, 'window_size': 10, 'device': 'tpu'}
    d_model = 2 * config['feat']   # 32
    nhead = 4
    S, T, B = 8, 8, 2

    key = jax.random.PRNGKey(0)
    kp, ks, km = jax.random.split(key, 3)
    params = init_params(kp, d_model, config['window_size'])
    packed = pack_params(params, S=S, B=B)
    src = jax.random.normal(ks, (S, B, d_model), jnp.float32)
    memory = jax.random.normal(km, (T, B, d_model), jnp.float32)

    out = transformer_decoder_layer(src, memory, packed, nhead)
    out = jax.block_until_ready(out)

    ref = reference_forward(src, memory, params, nhead)
    assert out.shape == (T, B, d_model)
    err = float(jnp.max(jnp.abs(out - ref)))
    assert jnp.allclose(out, ref, atol=1e-3, rtol=1e-3), f"max abs err {err}"
    print("KERNEL_OK")
</pallas_src>

<mosaic_0001>
module attributes {stable_mosaic.version = 11 : i64} {
  func.func @_decoder_layer_kernel(%arg0: memref<16x32xf32, #tpu.memory_space<vmem>>, %arg1: memref<16x32xf32, #tpu.memory_space<vmem>>, %arg2: memref<16x32xf32, #tpu.memory_space<vmem>>, %arg3: memref<32x96xf32, #tpu.memory_space<vmem>>, %arg4: memref<1x96xf32, #tpu.memory_space<vmem>>, %arg5: memref<32x32xf32, #tpu.memory_space<vmem>>, %arg6: memref<1x32xf32, #tpu.memory_space<vmem>>, %arg7: memref<32x32xf32, #tpu.memory_space<vmem>>, %arg8: memref<1x32xf32, #tpu.memory_space<vmem>>, %arg9: memref<32x64xf32, #tpu.memory_space<vmem>>, %arg10: memref<1x64xf32, #tpu.memory_space<vmem>>, %arg11: memref<32x32xf32, #tpu.memory_space<vmem>>, %arg12: memref<1x32xf32, #tpu.memory_space<vmem>>, %arg13: memref<16x32xf32, #tpu.memory_space<vmem>>) attributes {dimension_semantics = [], scalar_prefetch = 0 : i64, scratch_operands = 0 : i64, tpu.core_type = #tpu.core_type<tc>} {
    %c0 = arith.constant 0 : index
    %c0_0 = arith.constant 0 : index
    %0 = vector.load %arg0[%c0, %c0_0] : memref<16x32xf32, #tpu.memory_space<vmem>>, vector<16x32xf32>
    %c0_1 = arith.constant 0 : index
    %c0_2 = arith.constant 0 : index
    %1 = vector.load %arg2[%c0_1, %c0_2] : memref<16x32xf32, #tpu.memory_space<vmem>>, vector<16x32xf32>
    %2 = arith.addf %0, %1 : vector<16x32xf32>
    %c0_3 = arith.constant 0 : index
    %c0_4 = arith.constant 0 : index
    %3 = vector.load %arg3[%c0_3, %c0_4] : memref<32x96xf32, #tpu.memory_space<vmem>>, vector<32x96xf32>
    %cst = arith.constant dense<0.000000e+00> : vector<16x96xf32>
    %4 = tpu.matmul %2, %3, %cst {dimension_numbers = #tpu.dot_dimension_numbers<[1], [0], [0], [1], [0, 0, 1, 1], [], []>} : vector<16x32xf32>, vector<32x96xf32>, vector<16x96xf32> -> vector<16x96xf32>
    %c0_5 = arith.constant 0 : index
    %c0_6 = arith.constant 0 : index
    %5 = vector.load %arg4[%c0_5, %c0_6] : memref<1x96xf32, #tpu.memory_space<vmem>>, vector<1x96xf32>
    %6 = vector.broadcast %5 : vector<1x96xf32> to vector<16x96xf32>
    %7 = arith.addf %4, %6 : vector<16x96xf32>
    %8 = vector.extract_strided_slice %7 {offsets = [0, 0], sizes = [16, 32], strides = [1, 1]} : vector<16x96xf32> to vector<16x32xf32>
    %9 = vector.extract_strided_slice %7 {offsets = [0, 32], sizes = [16, 32], strides = [1, 1]} : vector<16x96xf32> to vector<16x32xf32>
    %10 = vector.extract_strided_slice %7 {offsets = [0, 64], sizes = [16, 32], strides = [1, 1]} : vector<16x96xf32> to vector<16x32xf32>
    %11 = vector.extract_strided_slice %8 {offsets = [0, 0], sizes = [8, 32], strides = [1, 1]} : vector<16x32xf32> to vector<8x32xf32>
    %12 = vector.extract_strided_slice %9 {offsets = [0, 0], sizes = [8, 32], strides = [1, 1]} : vector<16x32xf32> to vector<8x32xf32>
    %13 = vector.extract_strided_slice %10 {offsets = [0, 0], sizes = [8, 32], strides = [1, 1]} : vector<16x32xf32> to vector<8x32xf32>
    %14 = vector.extract_strided_slice %11 {offsets = [0, 0], sizes = [8, 8], strides = [1, 1]} : vector<8x32xf32> to vector<8x8xf32>
    %15 = vector.extract_strided_slice %12 {offsets = [0, 0], sizes = [8, 8], strides = [1, 1]} : vector<8x32xf32> to vector<8x8xf32>
    %cst_7 = arith.constant dense<0.000000e+00> : vector<8x8xf32>
    %16 = tpu.matmul %14, %15, %cst_7 {dimension_numbers = #tpu.dot_dimension_numbers<[1], [1], [0], [0], [0, 0, 1, 0], [], []>} : vector<8x8xf32>, vector<8x8xf32>, vector<8x8xf32> -> vector<8x8xf32>
    %cst_8 = arith.constant 0.353553385 : f32
    %17 = vector.broadcast %cst_8 : f32 to vector<8x8xf32>
    %18 = arith.mulf %16, %17 : vector<8x8xf32>
    %cst_9 = arith.constant dense<0xFF800000> : vector<8xf32>
    %19 = vector.multi_reduction <maximumf>, %18, %cst_9 [1] : vector<8x8xf32> to vector<8xf32>
    %20 = vector.shape_cast %19 : vector<8xf32> to vector<8x1xf32>
    %21 = vector.broadcast %20 : vector<8x1xf32> to vector<8x8xf32>
    %22 = arith.subf %18, %21 : vector<8x8xf32>
    %23 = math.exp %22 : vector<8x8xf32>
    %cst_10 = arith.constant dense<0.000000e+00> : vector<8xf32>
    %24 = vector.multi_reduction <add>, %23, %cst_10 [1] : vector<8x8xf32> to vector<8xf32>
    %25 = vector.shape_cast %24 : vector<8xf32> to vector<8x1xf32>
    %26 = vector.broadcast %25 : vector<8x1xf32> to vector<8x8xf32>
    %27 = arith.divf %23, %26 : vector<8x8xf32>
    %28 = vector.extract_strided_slice %13 {offsets = [0, 0], sizes = [8, 8], strides = [1, 1]} : vector<8x32xf32> to vector<8x8xf32>
    %cst_11 = arith.constant dense<0.000000e+00> : vector<8x8xf32>
    %29 = tpu.matmul %27, %28, %cst_11 {dimension_numbers = #tpu.dot_dimension_numbers<[1], [0], [0], [1], [0, 0, 1, 1], [], []>} : vector<8x8xf32>, vector<8x8xf32>, vector<8x8xf32> -> vector<8x8xf32>
    %30 = vector.extract_strided_slice %11 {offsets = [0, 8], sizes = [8, 8], strides = [1, 1]} : vector<8x32xf32> to vector<8x8xf32>
    %31 = vector.extract_strided_slice %12 {offsets = [0, 8], sizes = [8, 8], strides = [1, 1]} : vector<8x32xf32> to vector<8x8xf32>
    %cst_12 = arith.constant dense<0.000000e+00> : vector<8x8xf32>
    %32 = tpu.matmul %30, %31, %cst_12 {dimension_numbers = #tpu.dot_dimension_numbers<[1], [1], [0], [0], [0, 0, 1, 0], [], []>} : vector<8x8xf32>, vector<8x8xf32>, vector<8x8xf32> -> vector<8x8xf32>
    %cst_13 = arith.constant 0.353553385 : f32
    %33 = vector.broadcast %cst_13 : f32 to vector<8x8xf32>
    %34 = arith.mulf %32, %33 : vector<8x8xf32>
    %cst_14 = arith.constant dense<0xFF800000> : vector<8xf32>
    %35 = vector.multi_reduction <maximumf>, %34, %cst_14 [1] : vector<8x8xf32> to vector<8xf32>
    %36 = vector.shape_cast %35 : vector<8xf32> to vector<8x1xf32>
    %37 = vector.broadcast %36 : vector<8x1xf32> to vector<8x8xf32>
    %38 = arith.subf %34, %37 : vector<8x8xf32>
    %39 = math.exp %38 : vector<8x8xf32>
    %cst_15 = arith.constant dense<0.000000e+00> : vector<8xf32>
    %40 = vector.multi_reduction <add>, %39, %cst_15 [1] : vector<8x8xf32> to vector<8xf32>
    %41 = vector.shape_cast %40 : vector<8xf32> to vector<8x1xf32>
    %42 = vector.broadcast %41 : vector<8x1xf32> to vector<8x8xf32>
    %43 = arith.divf %39, %42 : vector<8x8xf32>
    %44 = vector.extract_strided_slice %13 {offsets = [0, 8], sizes = [8, 8], strides = [1, 1]} : vector<8x32xf32> to vector<8x8xf32>
    %cst_16 = arith.constant dense<0.000000e+00> : vector<8x8xf32>
    %45 = tpu.matmul %43, %44, %cst_16 {dimension_numbers = #tpu.dot_dimension_numbers<[1], [0], [0], [1], [0, 0, 1, 1], [], []>} : vector<8x8xf32>, vector<8x8xf32>, vector<8x8xf32> -> vector<8x8xf32>
    %46 = vector.extract_strided_slice %11 {offsets = [0, 16], sizes = [8, 8], strides = [1, 1]} : vector<8x32xf32> to vector<8x8xf32>
    %47 = vector.extract_strided_slice %12 {offsets = [0, 16], sizes = [8, 8], strides = [1, 1]} : vector<8x32xf32> to vector<8x8xf32>
    %cst_17 = arith.constant dense<0.000000e+00> : vector<8x8xf32>
    %48 = tpu.matmul %46, %47, %cst_17 {dimension_numbers = #tpu.dot_dimension_numbers<[1], [1], [0], [0], [0, 0, 1, 0], [], []>} : vector<8x8xf32>, vector<8x8xf32>, vector<8x8xf32> -> vector<8x8xf32>
    %cst_18 = arith.constant 0.353553385 : f32
    %49 = vector.broadcast %cst_18 : f32 to vector<8x8xf32>
    %50 = arith.mulf %48, %49 : vector<8x8xf32>
    %cst_19 = arith.constant dense<0xFF800000> : vector<8xf32>
    %51 = vector.multi_reduction <maximumf>, %50, %cst_19 [1] : vector<8x8xf32> to vector<8xf32>
    %52 = vector.shape_cast %51 : vector<8xf32> to vector<8x1xf32>
    %53 = vector.broadcast %52 : vector<8x1xf32> to vector<8x8xf32>
    %54 = arith.subf %50, %53 : vector<8x8xf32>
    %55 = math.exp %54 : vector<8x8xf32>
    %cst_20 = arith.constant dense<0.000000e+00> : vector<8xf32>
    %56 = vector.multi_reduction <add>, %55, %cst_20 [1] : vector<8x8xf32> to vector<8xf32>
    %57 = vector.shape_cast %56 : vector<8xf32> to vector<8x1xf32>
    %58 = vector.broadcast %57 : vector<8x1xf32> to vector<8x8xf32>
    %59 = arith.divf %55, %58 : vector<8x8xf32>
    %60 = vector.extract_strided_slice %13 {offsets = [0, 16], sizes = [8, 8], strides = [1, 1]} : vector<8x32xf32> to vector<8x8xf32>
    %cst_21 = arith.constant dense<0.000000e+00> : vector<8x8xf32>
    %61 = tpu.matmul %59, %60, %cst_21 {dimension_numbers = #tpu.dot_dimension_numbers<[1], [0], [0], [1], [0, 0, 1, 1], [], []>} : vector<8x8xf32>, vector<8x8xf32>, vector<8x8xf32> -> vector<8x8xf32>
    %62 = vector.extract_strided_slice %11 {offsets = [0, 24], sizes = [8, 8], strides = [1, 1]} : vector<8x32xf32> to vector<8x8xf32>
    %63 = vector.extract_strided_slice %12 {offsets = [0, 24], sizes = [8, 8], strides = [1, 1]} : vector<8x32xf32> to vector<8x8xf32>
    %cst_22 = arith.constant dense<0.000000e+00> : vector<8x8xf32>
    %64 = tpu.matmul %62, %63, %cst_22 {dimension_numbers = #tpu.dot_dimension_numbers<[1], [1], [0], [0], [0, 0, 1, 0], [], []>} : vector<8x8xf32>, vector<8x8xf32>, vector<8x8xf32> -> vector<8x8xf32>
    %cst_23 = arith.constant 0.353553385 : f32
    %65 = vector.broadcast %cst_23 : f32 to vector<8x8xf32>
    %66 = arith.mulf %64, %65 : vector<8x8xf32>
    %cst_24 = arith.constant dense<0xFF800000> : vector<8xf32>
    %67 = vector.multi_reduction <maximumf>, %66, %cst_24 [1] : vector<8x8xf32> to vector<8xf32>
    %68 = vector.shape_cast %67 : vector<8xf32> to vector<8x1xf32>
    %69 = vector.broadcast %68 : vector<8x1xf32> to vector<8x8xf32>
    %70 = arith.subf %66, %69 : vector<8x8xf32>
    %71 = math.exp %70 : vector<8x8xf32>
    %cst_25 = arith.constant dense<0.000000e+00> : vector<8xf32>
    %72 = vector.multi_reduction <add>, %71, %cst_25 [1] : vector<8x8xf32> to vector<8xf32>
    %73 = vector.shape_cast %72 : vector<8xf32> to vector<8x1xf32>
    %74 = vector.broadcast %73 : vector<8x1xf32> to vector<8x8xf32>
    %75 = arith.divf %71, %74 : vector<8x8xf32>
    %76 = vector.extract_strided_slice %13 {offsets = [0, 24], sizes = [8, 8], strides = [1, 1]} : vector<8x32xf32> to vector<8x8xf32>
    %cst_26 = arith.constant dense<0.000000e+00> : vector<8x8xf32>
    %77 = tpu.matmul %75, %76, %cst_26 {dimension_numbers = #tpu.dot_dimension_numbers<[1], [0], [0], [1], [0, 0, 1, 1], [], []>} : vector<8x8xf32>, vector<8x8xf32>, vector<8x8xf32> -> vector<8x8xf32>
    %78 = tpu.concatenate %29, %45, %61, %77 in 1 : vector<8x8xf32>, vector<8x8xf32>, vector<8x8xf32>, vector<8x8xf32> -> vector<8x32xf32>
    %79 = vector.extract_strided_slice %8 {offsets = [8, 0], sizes = [8, 32], strides = [1, 1]} : vector<16x32xf32> to vector<8x32xf32>
    %80 = vector.extract_strided_slice %9 {offsets = [8, 0], sizes = [8, 32], strides = [1, 1]} : vector<16x32xf32> to vector<8x32xf32>
    %81 = vector.extract_strided_slice %10 {offsets = [8, 0], sizes = [8, 32], strides = [1, 1]} : vector<16x32xf32> to vector<8x32xf32>
    %82 = vector.extract_strided_slice %79 {offsets = [0, 0], sizes = [8, 8], strides = [1, 1]} : vector<8x32xf32> to vector<8x8xf32>
    %83 = vector.extract_strided_slice %80 {offsets = [0, 0], sizes = [8, 8], strides = [1, 1]} : vector<8x32xf32> to vector<8x8xf32>
    %cst_27 = arith.constant dense<0.000000e+00> : vector<8x8xf32>
    %84 = tpu.matmul %82, %83, %cst_27 {dimension_numbers = #tpu.dot_dimension_numbers<[1], [1], [0], [0], [0, 0, 1, 0], [], []>} : vector<8x8xf32>, vector<8x8xf32>, vector<8x8xf32> -> vector<8x8xf32>
    %cst_28 = arith.constant 0.353553385 : f32
    %85 = vector.broadcast %cst_28 : f32 to vector<8x8xf32>
    %86 = arith.mulf %84, %85 : vector<8x8xf32>
    %cst_29 = arith.constant dense<0xFF800000> : vector<8xf32>
    %87 = vector.multi_reduction <maximumf>, %86, %cst_29 [1] : vector<8x8xf32> to vector<8xf32>
    %88 = vector.shape_cast %87 : vector<8xf32> to vector<8x1xf32>
    %89 = vector.broadcast %88 : vector<8x1xf32> to vector<8x8xf32>
    %90 = arith.subf %86, %89 : vector<8x8xf32>
    %91 = math.exp %90 : vector<8x8xf32>
    %cst_30 = arith.constant dense<0.000000e+00> : vector<8xf32>
    %92 = vector.multi_reduction <add>, %91, %cst_30 [1] : vector<8x8xf32> to vector<8xf32>
    %93 = vector.shape_cast %92 : vector<8xf32> to vector<8x1xf32>
    %94 = vector.broadcast %93 : vector<8x1xf32> to vector<8x8xf32>
    %95 = arith.divf %91, %94 : vector<8x8xf32>
    %96 = vector.extract_strided_slice %81 {offsets = [0, 0], sizes = [8, 8], strides = [1, 1]} : vector<8x32xf32> to vector<8x8xf32>
    %cst_31 = arith.constant dense<0.000000e+00> : vector<8x8xf32>
    %97 = tpu.matmul %95, %96, %cst_31 {dimension_numbers = #tpu.dot_dimension_numbers<[1], [0], [0], [1], [0, 0, 1, 1], [], []>} : vector<8x8xf32>, vector<8x8xf32>, vector<8x8xf32> -> vector<8x8xf32>
    %98 = vector.extract_strided_slice %79 {offsets = [0, 8], sizes = [8, 8], strides = [1, 1]} : vector<8x32xf32> to vector<8x8xf32>
    %99 = vector.extract_strided_slice %80 {offsets = [0, 8], sizes = [8, 8], strides = [1, 1]} : vector<8x32xf32> to vector<8x8xf32>
    %cst_32 = arith.constant dense<0.000000e+00> : vector<8x8xf32>
    %100 = tpu.matmul %98, %99, %cst_32 {dimension_numbers = #tpu.dot_dimension_numbers<[1], [1], [0], [0], [0, 0, 1, 0], [], []>} : vector<8x8xf32>, vector<8x8xf32>, vector<8x8xf32> -> vector<8x8xf32>
    %cst_33 = arith.constant 0.353553385 : f32
    %101 = vector.broadcast %cst_33 : f32 to vector<8x8xf32>
    %102 = arith.mulf %100, %101 : vector<8x8xf32>
    %cst_34 = arith.constant dense<0xFF800000> : vector<8xf32>
    %103 = vector.multi_reduction <maximumf>, %102, %cst_34 [1] : vector<8x8xf32> to vector<8xf32>
    %104 = vector.shape_cast %103 : vector<8xf32> to vector<8x1xf32>
    %105 = vector.broadcast %104 : vector<8x1xf32> to vector<8x8xf32>
    %106 = arith.subf %102, %105 : vector<8x8xf32>
    %107 = math.exp %106 : vector<8x8xf32>
    %cst_35 = arith.constant dense<0.000000e+00> : vector<8xf32>
    %108 = vector.multi_reduction <add>, %107, %cst_35 [1] : vector<8x8xf32> to vector<8xf32>
    %109 = vector.shape_cast %108 : vector<8xf32> to vector<8x1xf32>
    %110 = vector.broadcast %109 : vector<8x1xf32> to vector<8x8xf32>
    %111 = arith.divf %107, %110 : vector<8x8xf32>
    %112 = vector.extract_strided_slice %81 {offsets = [0, 8], sizes = [8, 8], strides = [1, 1]} : vector<8x32xf32> to vector<8x8xf32>
    %cst_36 = arith.constant dense<0.000000e+00> : vector<8x8xf32>
    %113 = tpu.matmul %111, %112, %cst_36 {dimension_numbers = #tpu.dot_dimension_numbers<[1], [0], [0], [1], [0, 0, 1, 1], [], []>} : vector<8x8xf32>, vector<8x8xf32>, vector<8x8xf32> -> vector<8x8xf32>
    %114 = vector.extract_strided_slice %79 {offsets = [0, 16], sizes = [8, 8], strides = [1, 1]} : vector<8x32xf32> to vector<8x8xf32>
    %115 = vector.extract_strided_slice %80 {offsets = [0, 16], sizes = [8, 8], strides = [1, 1]} : vector<8x32xf32> to vector<8x8xf32>
    %cst_37 = arith.constant dense<0.000000e+00> : vector<8x8xf32>
    %116 = tpu.matmul %114, %115, %cst_37 {dimension_numbers = #tpu.dot_dimension_numbers<[1], [1], [0], [0], [0, 0, 1, 0], [], []>} : vector<8x8xf32>, vector<8x8xf32>, vector<8x8xf32> -> vector<8x8xf32>
    %cst_38 = arith.constant 0.353553385 : f32
    %117 = vector.broadcast %cst_38 : f32 to vector<8x8xf32>
    %118 = arith.mulf %116, %117 : vector<8x8xf32>
    %cst_39 = arith.constant dense<0xFF800000> : vector<8xf32>
    %119 = vector.multi_reduction <maximumf>, %118, %cst_39 [1] : vector<8x8xf32> to vector<8xf32>
    %120 = vector.shape_cast %119 : vector<8xf32> to vector<8x1xf32>
    %121 = vector.broadcast %120 : vector<8x1xf32> to vector<8x8xf32>
    %122 = arith.subf %118, %121 : vector<8x8xf32>
    %123 = math.exp %122 : vector<8x8xf32>
    %cst_40 = arith.constant dense<0.000000e+00> : vector<8xf32>
    %124 = vector.multi_reduction <add>, %123, %cst_40 [1] : vector<8x8xf32> to vector<8xf32>
    %125 = vector.shape_cast %124 : vector<8xf32> to vector<8x1xf32>
    %126 = vector.broadcast %125 : vector<8x1xf32> to vector<8x8xf32>
    %127 = arith.divf %123, %126 : vector<8x8xf32>
    %128 = vector.extract_strided_slice %81 {offsets = [0, 16], sizes = [8, 8], strides = [1, 1]} : vector<8x32xf32> to vector<8x8xf32>
    %cst_41 = arith.constant dense<0.000000e+00> : vector<8x8xf32>
    %129 = tpu.matmul %127, %128, %cst_41 {dimension_numbers = #tpu.dot_dimension_numbers<[1], [0], [0], [1], [0, 0, 1, 1], [], []>} : vector<8x8xf32>, vector<8x8xf32>, vector<8x8xf32> -> vector<8x8xf32>
    %130 = vector.extract_strided_slice %79 {offsets = [0, 24], sizes = [8, 8], strides = [1, 1]} : vector<8x32xf32> to vector<8x8xf32>
    %131 = vector.extract_strided_slice %80 {offsets = [0, 24], sizes = [8, 8], strides = [1, 1]} : vector<8x32xf32> to vector<8x8xf32>
    %cst_42 = arith.constant dense<0.000000e+00> : vector<8x8xf32>
    %132 = tpu.matmul %130, %131, %cst_42 {dimension_numbers = #tpu.dot_dimension_numbers<[1], [1], [0], [0], [0, 0, 1, 0], [], []>} : vector<8x8xf32>, vector<8x8xf32>, vector<8x8xf32> -> vector<8x8xf32>
    %cst_43 = arith.constant 0.353553385 : f32
    %133 = vector.broadcast %cst_43 : f32 to vector<8x8xf32>
    %134 = arith.mulf %132, %133 : vector<8x8xf32>
    %cst_44 = arith.constant dense<0xFF800000> : vector<8xf32>
    %135 = vector.multi_reduction <maximumf>, %134, %cst_44 [1] : vector<8x8xf32> to vector<8xf32>
    %136 = vector.shape_cast %135 : vector<8xf32> to vector<8x1xf32>
    %137 = vector.broadcast %136 : vector<8x1xf32> to vector<8x8xf32>
    %138 = arith.subf %134, %137 : vector<8x8xf32>
    %139 = math.exp %138 : vector<8x8xf32>
    %cst_45 = arith.constant dense<0.000000e+00> : vector<8xf32>
    %140 = vector.multi_reduction <add>, %139, %cst_45 [1] : vector<8x8xf32> to vector<8xf32>
    %141 = vector.shape_cast %140 : vector<8xf32> to vector<8x1xf32>
    %142 = vector.broadcast %141 : vector<8x1xf32> to vector<8x8xf32>
    %143 = arith.divf %139, %142 : vector<8x8xf32>
    %144 = vector.extract_strided_slice %81 {offsets = [0, 24], sizes = [8, 8], strides = [1, 1]} : vector<8x32xf32> to vector<8x8xf32>
    %cst_46 = arith.constant dense<0.000000e+00> : vector<8x8xf32>
    %145 = tpu.matmul %143, %144, %cst_46 {dimension_numbers = #tpu.dot_dimension_numbers<[1], [0], [0], [1], [0, 0, 1, 1], [], []>} : vector<8x8xf32>, vector<8x8xf32>, vector<8x8xf32> -> vector<8x8xf32>
    %146 = tpu.concatenate %97, %113, %129, %145 in 1 : vector<8x8xf32>, vector<8x8xf32>, vector<8x8xf32>, vector<8x8xf32> -> vector<8x32xf32>
    %147 = tpu.concatenate %78, %146 in 0 : vector<8x32xf32>, vector<8x32xf32> -> vector<16x32xf32>
    %c0_47 = arith.constant 0 : index
    %c0_48 = arith.constant 0 : index
    %148 = vector.load %arg5[%c0_47, %c0_48] : memref<32x32xf32, #tpu.memory_space<vmem>>, vector<32x32xf32>
    %cst_49 = arith.constant dense<0.000000e+00> : vector<16x32xf32>
    %149 = tpu.matmul %147, %148, %cst_49 {dimension_numbers = #tpu.dot_dimension_numbers<[1], [0], [0], [1], [0, 0, 1, 1], [], []>} : vector<16x32xf32>, vector<32x32xf32>, vector<16x32xf32> -> vector<16x32xf32>
    %c0_50 = arith.constant 0 : index
    %c0_51 = arith.constant 0 : index
    %150 = vector.load %arg6[%c0_50, %c0_51] : memref<1x32xf32, #tpu.memory_space<vmem>>, vector<1x32xf32>
    %151 = vector.broadcast %150 : vector<1x32xf32> to vector<16x32xf32>
    %152 = arith.addf %149, %151 : vector<16x32xf32>
    %153 = arith.addf %2, %152 : vector<16x32xf32>
    %154 = vector.extract_strided_slice %153 {offsets = [0, 0], sizes = [8, 32], strides = [1, 1]} : vector<16x32xf32> to vector<8x32xf32>
    %155 = vector.shape_cast %154 : vector<8x32xf32> to vector<1x8x32xf32>
    %cst_52 = arith.constant dense<0.000000e+00> : vector<1xf32>
    %156 = vector.multi_reduction <add>, %155, %cst_52 [1, 2] : vector<1x8x32xf32> to vector<1xf32>
    %157 = vector.shape_cast %156 : vector<1xf32> to vector<1x1x1xf32>
    %158 = vector.extract %157[0, 0, 0] : f32 from vector<1x1x1xf32>
    %cst_53 = arith.constant 2.560000e+02 : f32
    %159 = arith.divf %158, %cst_53 : f32
    %160 = vector.broadcast %159 : f32 to vector<8x32xf32>
    %161 = arith.subf %154, %160 : vector<8x32xf32>
    %162 = vector.broadcast %159 : f32 to vector<8x32xf32>
    %163 = arith.subf %154, %162 : vector<8x32xf32>
    %164 = arith.mulf %161, %163 : vector<8x32xf32>
    %165 = vector.shape_cast %164 : vector<8x32xf32> to vector<1x8x32xf32>
    %cst_54 = arith.constant dense<0.000000e+00> : vector<1xf32>
    %166 = vector.multi_reduction <add>, %165, %cst_54 [1, 2] : vector<1x8x32xf32> to vector<1xf32>
    %167 = vector.shape_cast %166 : vector<1xf32> to vector<1x1x1xf32>
    %168 = vector.extract %167[0, 0, 0] : f32 from vector<1x1x1xf32>
    %cst_55 = arith.constant 2.560000e+02 : f32
    %169 = arith.divf %168, %cst_55 : f32
    %170 = vector.broadcast %159 : f32 to vector<8x32xf32>
    %171 = arith.subf %154, %170 : vector<8x32xf32>
    %cst_56 = arith.constant 9.99999974E-6 : f32
    %172 = arith.addf %169, %cst_56 : f32
    %173 = math.rsqrt %172 : f32
    %174 = vector.broadcast %173 : f32 to vector<8x32xf32>
    %175 = arith.mulf %171, %174 : vector<8x32xf32>
    %176 = vector.extract_strided_slice %153 {offsets = [8, 0], sizes = [8, 32], strides = [1, 1]} : vector<16x32xf32> to vector<8x32xf32>
    %177 = vector.shape_cast %176 : vector<8x32xf32> to vector<1x8x32xf32>
    %cst_57 = arith.constant dense<0.000000e+00> : vector<1xf32>
    %178 = vector.multi_reduction <add>, %177, %cst_57 [1, 2] : vector<1x8x32xf32> to vector<1xf32>
    %179 = vector.shape_cast %178 : vector<1xf32> to vector<1x1x1xf32>
    %180 = vector.extract %179[0, 0, 0] : f32 from vector<1x1x1xf32>
    %cst_58 = arith.constant 2.560000e+02 : f32
    %181 = arith.divf %180, %cst_58 : f32
    %182 = vector.broadcast %181 : f32 to vector<8x32xf32>
    %183 = arith.subf %176, %182 : vector<8x32xf32>
    %184 = vector.broadcast %181 : f32 to vector<8x32xf32>
    %185 = arith.subf %176, %184 : vector<8x32xf32>
    %186 = arith.mulf %183, %185 : vector<8x32xf32>
    %187 = vector.shape_cast %186 : vector<8x32xf32> to vector<1x8x32xf32>
    %cst_59 = arith.constant dense<0.000000e+00> : vector<1xf32>
    %188 = vector.multi_reduction <add>, %187, %cst_59 [1, 2] : vector<1x8x32xf32> to vector<1xf32>
    %189 = vector.shape_cast %188 : vector<1xf32> to vector<1x1x1xf32>
    %190 = vector.extract %189[0, 0, 0] : f32 from vector<1x1x1xf32>
    %cst_60 = arith.constant 2.560000e+02 : f32
    %191 = arith.divf %190, %cst_60 : f32
    %192 = vector.broadcast %181 : f32 to vector<8x32xf32>
    %193 = arith.subf %176, %192 : vector<8x32xf32>
    %cst_61 = arith.constant 9.99999974E-6 : f32
    %194 = arith.addf %191, %cst_61 : f32
    %195 = math.rsqrt %194 : f32
    %196 = vector.broadcast %195 : f32 to vector<8x32xf32>
    %197 = arith.mulf %193, %196 : vector<8x32xf32>
    %198 = tpu.concatenate %175, %197 in 0 : vector<8x32xf32>, vector<8x32xf32> -> vector<16x32xf32>
    %c0_62 = arith.constant 0 : index
    %c0_63 = arith.constant 0 : index
    %199 = vector.load %arg1[%c0_62, %c0_63] : memref<16x32xf32, #tpu.memory_space<vmem>>, vector<16x32xf32>
    %c0_64 = arith.constant 0 : index
    %c0_65 = arith.constant 0 : index
    %200 = vector.load %arg7[%c0_64, %c0_65] : memref<32x32xf32, #tpu.memory_space<vmem>>, vector<32x32xf32>
    %cst_66 = arith.constant dense<0.000000e+00> : vector<16x32xf32>
    %201 = tpu.matmul %199, %200, %cst_66 {dimension_numbers = #tpu.dot_dimension_numbers<[1], [0], [0], [1], [0, 0, 1, 1], [], []>} : vector<16x32xf32>, vector<32x32xf32>, vector<16x32xf32> -> vector<16x32xf32>
    %c0_67 = arith.constant 0 : index
    %c0_68 = arith.constant 0 : index
    %202 = vector.load %arg8[%c0_67, %c0_68] : memref<1x32xf32, #tpu.memory_space<vmem>>, vector<1x32xf32>
    %203 = vector.broadcast %202 : vector<1x32xf32> to vector<16x32xf32>
    %204 = arith.addf %201, %203 : vector<16x32xf32>
    %c0_69 = arith.constant 0 : index
    %c0_70 = arith.constant 0 : index
    %205 = vector.load %arg9[%c0_69, %c0_70] : memref<32x64xf32, #tpu.memory_space<vmem>>, vector<32x64xf32>
    %cst_71 = arith.constant dense<0.000000e+00> : vector<16x64xf32>
    %206 = tpu.matmul %198, %205, %cst_71 {dimension_numbers = #tpu.dot_dimension_numbers<[1], [0], [0], [1], [0, 0, 1, 1], [], []>} : vector<16x32xf32>, vector<32x64xf32>, vector<16x64xf32> -> vector<16x64xf32>
    %c0_72 = arith.constant 0 : index
    %c0_73 = arith.constant 0 : index
    %207 = vector.load %arg10[%c0_72, %c0_73] : memref<1x64xf32, #tpu.memory_space<vmem>>, vector<1x64xf32>
    %208 = vector.broadcast %207 : vector<1x64xf32> to vector<16x64xf32>
    %209 = arith.addf %206, %208 : vector<16x64xf32>
    %210 = vector.extract_strided_slice %209 {offsets = [0, 0], sizes = [16, 32], strides = [1, 1]} : vector<16x64xf32> to vector<16x32xf32>
    %211 = vector.extract_strided_slice %209 {offsets = [0, 32], sizes = [16, 32], strides = [1, 1]} : vector<16x64xf32> to vector<16x32xf32>
    %212 = vector.extract_strided_slice %204 {offsets = [0, 0], sizes = [8, 32], strides = [1, 1]} : vector<16x32xf32> to vector<8x32xf32>
    %213 = vector.extract_strided_slice %210 {offsets = [0, 0], sizes = [8, 32], strides = [1, 1]} : vector<16x32xf32> to vector<8x32xf32>
    %214 = vector.extract_strided_slice %211 {offsets = [0, 0], sizes = [8, 32], strides = [1, 1]} : vector<16x32xf32> to vector<8x32xf32>
    %215 = vector.extract_strided_slice %212 {offsets = [0, 0], sizes = [8, 8], strides = [1, 1]} : vector<8x32xf32> to vector<8x8xf32>
    %216 = vector.extract_strided_slice %213 {offsets = [0, 0], sizes = [8, 8], strides = [1, 1]} : vector<8x32xf32> to vector<8x8xf32>
    %cst_74 = arith.constant dense<0.000000e+00> : vector<8x8xf32>
    %217 = tpu.matmul %215, %216, %cst_74 {dimension_numbers = #tpu.dot_dimension_numbers<[1], [1], [0], [0], [0, 0, 1, 0], [], []>} : vector<8x8xf32>, vector<8x8xf32>, vector<8x8xf32> -> vector<8x8xf32>
    %cst_75 = arith.constant 0.353553385 : f32
    %218 = vector.broadcast %cst_75 : f32 to vector<8x8xf32>
    %219 = arith.mulf %217, %218 : vector<8x8xf32>
    %cst_76 = arith.constant dense<0xFF800000> : vector<8xf32>
    %220 = vector.multi_reduction <maximumf>, %219, %cst_76 [1] : vector<8x8xf32> to vector<8xf32>
    %221 = vector.shape_cast %220 : vector<8xf32> to vector<8x1xf32>
    %222 = vector.broadcast %221 : vector<8x1xf32> to vector<8x8xf32>
    %223 = arith.subf %219, %222 : vector<8x8xf32>
    %224 = math.exp %223 : vector<8x8xf32>
    %cst_77 = arith.constant dense<0.000000e+00> : vector<8xf32>
    %225 = vector.multi_reduction <add>, %224, %cst_77 [1] : vector<8x8xf32> to vector<8xf32>
    %226 = vector.shape_cast %225 : vector<8xf32> to vector<8x1xf32>
    %227 = vector.broadcast %226 : vector<8x1xf32> to vector<8x8xf32>
    %228 = arith.divf %224, %227 : vector<8x8xf32>
    %229 = vector.extract_strided_slice %214 {offsets = [0, 0], sizes = [8, 8], strides = [1, 1]} : vector<8x32xf32> to vector<8x8xf32>
    %cst_78 = arith.constant dense<0.000000e+00> : vector<8x8xf32>
    %230 = tpu.matmul %228, %229, %cst_78 {dimension_numbers = #tpu.dot_dimension_numbers<[1], [0], [0], [1], [0, 0, 1, 1], [], []>} : vector<8x8xf32>, vector<8x8xf32>, vector<8x8xf32> -> vector<8x8xf32>
    %231 = vector.extract_strided_slice %212 {offsets = [0, 8], sizes = [8, 8], strides = [1, 1]} : vector<8x32xf32> to vector<8x8xf32>
    %232 = vector.extract_strided_slice %213 {offsets = [0, 8], sizes = [8, 8], strides = [1, 1]} : vector<8x32xf32> to vector<8x8xf32>
    %cst_79 = arith.constant dense<0.000000e+00> : vector<8x8xf32>
    %233 = tpu.matmul %231, %232, %cst_79 {dimension_numbers = #tpu.dot_dimension_numbers<[1], [1], [0], [0], [0, 0, 1, 0], [], []>} : vector<8x8xf32>, vector<8x8xf32>, vector<8x8xf32> -> vector<8x8xf32>
    %cst_80 = arith.constant 0.353553385 : f32
    %234 = vector.broadcast %cst_80 : f32 to vector<8x8xf32>
    %235 = arith.mulf %233, %234 : vector<8x8xf32>
    %cst_81 = arith.constant dense<0xFF800000> : vector<8xf32>
    %236 = vector.multi_reduction <maximumf>, %235, %cst_81 [1] : vector<8x8xf32> to vector<8xf32>
    %237 = vector.shape_cast %236 : vector<8xf32> to vector<8x1xf32>
    %238 = vector.broadcast %237 : vector<8x1xf32> to vector<8x8xf32>
    %239 = arith.subf %235, %238 : vector<8x8xf32>
    %240 = math.exp %239 : vector<8x8xf32>
    %cst_82 = arith.constant dense<0.000000e+00> : vector<8xf32>
    %241 = vector.multi_reduction <add>, %240, %cst_82 [1] : vector<8x8xf32> to vector<8xf32>
    %242 = vector.shape_cast %241 : vector<8xf32> to vector<8x1xf32>
    %243 = vector.broadcast %242 : vector<8x1xf32> to vector<8x8xf32>
    %244 = arith.divf %240, %243 : vector<8x8xf32>
    %245 = vector.extract_strided_slice %214 {offsets = [0, 8], sizes = [8, 8], strides = [1, 1]} : vector<8x32xf32> to vector<8x8xf32>
    %cst_83 = arith.constant dense<0.000000e+00> : vector<8x8xf32>
    %246 = tpu.matmul %244, %245, %cst_83 {dimension_numbers = #tpu.dot_dimension_numbers<[1], [0], [0], [1], [0, 0, 1, 1], [], []>} : vector<8x8xf32>, vector<8x8xf32>, vector<8x8xf32> -> vector<8x8xf32>
    %247 = vector.extract_strided_slice %212 {offsets = [0, 16], sizes = [8, 8], strides = [1, 1]} : vector<8x32xf32> to vector<8x8xf32>
    %248 = vector.extract_strided_slice %213 {offsets = [0, 16], sizes = [8, 8], strides = [1, 1]} : vector<8x32xf32> to vector<8x8xf32>
    %cst_84 = arith.constant dense<0.000000e+00> : vector<8x8xf32>
    %249 = tpu.matmul %247, %248, %cst_84 {dimension_numbers = #tpu.dot_dimension_numbers<[1], [1], [0], [0], [0, 0, 1, 0], [], []>} : vector<8x8xf32>, vector<8x8xf32>, vector<8x8xf32> -> vector<8x8xf32>
    %cst_85 = arith.constant 0.353553385 : f32
    %250 = vector.broadcast %cst_85 : f32 to vector<8x8xf32>
    %251 = arith.mulf %249, %250 : vector<8x8xf32>
    %cst_86 = arith.constant dense<0xFF800000> : vector<8xf32>
    %252 = vector.multi_reduction <maximumf>, %251, %cst_86 [1] : vector<8x8xf32> to vector<8xf32>
    %253 = vector.shape_cast %252 : vector<8xf32> to vector<8x1xf32>
    %254 = vector.broadcast %253 : vector<8x1xf32> to vector<8x8xf32>
    %255 = arith.subf %251, %254 : vector<8x8xf32>
    %256 = math.exp %255 : vector<8x8xf32>
    %cst_87 = arith.constant dense<0.000000e+00> : vector<8xf32>
    %257 = vector.multi_reduction <add>, %256, %cst_87 [1] : vector<8x8xf32> to vector<8xf32>
    %258 = vector.shape_cast %257 : vector<8xf32> to vector<8x1xf32>
    %259 = vector.broadcast %258 : vector<8x1xf32> to vector<8x8xf32>
    %260 = arith.divf %256, %259 : vector<8x8xf32>
    %261 = vector.extract_strided_slice %214 {offsets = [0, 16], sizes = [8, 8], strides = [1, 1]} : vector<8x32xf32> to vector<8x8xf32>
    %cst_88 = arith.constant dense<0.000000e+00> : vector<8x8xf32>
    %262 = tpu.matmul %260, %261, %cst_88 {dimension_numbers = #tpu.dot_dimension_numbers<[1], [0], [0], [1], [0, 0, 1, 1], [], []>} : vector<8x8xf32>, vector<8x8xf32>, vector<8x8xf32> -> vector<8x8xf32>
    %263 = vector.extract_strided_slice %212 {offsets = [0, 24], sizes = [8, 8], strides = [1, 1]} : vector<8x32xf32> to vector<8x8xf32>
    %264 = vector.extract_strided_slice %213 {offsets = [0, 24], sizes = [8, 8], strides = [1, 1]} : vector<8x32xf32> to vector<8x8xf32>
    %cst_89 = arith.constant dense<0.000000e+00> : vector<8x8xf32>
    %265 = tpu.matmul %263, %264, %cst_89 {dimension_numbers = #tpu.dot_dimension_numbers<[1], [1], [0], [0], [0, 0, 1, 0], [], []>} : vector<8x8xf32>, vector<8x8xf32>, vector<8x8xf32> -> vector<8x8xf32>
    %cst_90 = arith.constant 0.353553385 : f32
    %266 = vector.broadcast %cst_90 : f32 to vector<8x8xf32>
    %267 = arith.mulf %265, %266 : vector<8x8xf32>
    %cst_91 = arith.constant dense<0xFF800000> : vector<8xf32>
    %268 = vector.multi_reduction <maximumf>, %267, %cst_91 [1] : vector<8x8xf32> to vector<8xf32>
    %269 = vector.shape_cast %268 : vector<8xf32> to vector<8x1xf32>
    %270 = vector.broadcast %269 : vector<8x1xf32> to vector<8x8xf32>
    %271 = arith.subf %267, %270 : vector<8x8xf32>
    %272 = math.exp %271 : vector<8x8xf32>
    %cst_92 = arith.constant dense<0.000000e+00> : vector<8xf32>
    %273 = vector.multi_reduction <add>, %272, %cst_92 [1] : vector<8x8xf32> to vector<8xf32>
    %274 = vector.shape_cast %273 : vector<8xf32> to vector<8x1xf32>
    %275 = vector.broadcast %274 : vector<8x1xf32> to vector<8x8xf32>
    %276 = arith.divf %272, %275 : vector<8x8xf32>
    %277 = vector.extract_strided_slice %214 {offsets = [0, 24], sizes = [8, 8], strides = [1, 1]} : vector<8x32xf32> to vector<8x8xf32>
    %cst_93 = arith.constant dense<0.000000e+00> : vector<8x8xf32>
    %278 = tpu.matmul %276, %277, %cst_93 {dimension_numbers = #tpu.dot_dimension_numbers<[1], [0], [0], [1], [0, 0, 1, 1], [], []>} : vector<8x8xf32>, vector<8x8xf32>, vector<8x8xf32> -> vector<8x8xf32>
    %279 = tpu.concatenate %230, %246, %262, %278 in 1 : vector<8x8xf32>, vector<8x8xf32>, vector<8x8xf32>, vector<8x8xf32> -> vector<8x32xf32>
    %280 = vector.extract_strided_slice %204 {offsets = [8, 0], sizes = [8, 32], strides = [1, 1]} : vector<16x32xf32> to vector<8x32xf32>
    %281 = vector.extract_strided_slice %210 {offsets = [8, 0], sizes = [8, 32], strides = [1, 1]} : vector<16x32xf32> to vector<8x32xf32>
    %282 = vector.extract_strided_slice %211 {offsets = [8, 0], sizes = [8, 32], strides = [1, 1]} : vector<16x32xf32> to vector<8x32xf32>
    %283 = vector.extract_strided_slice %280 {offsets = [0, 0], sizes = [8, 8], strides = [1, 1]} : vector<8x32xf32> to vector<8x8xf32>
    %284 = vector.extract_strided_slice %281 {offsets = [0, 0], sizes = [8, 8], strides = [1, 1]} : vector<8x32xf32> to vector<8x8xf32>
    %cst_94 = arith.constant dense<0.000000e+00> : vector<8x8xf32>
    %285 = tpu.matmul %283, %284, %cst_94 {dimension_numbers = #tpu.dot_dimension_numbers<[1], [1], [0], [0], [0, 0, 1, 0], [], []>} : vector<8x8xf32>, vector<8x8xf32>, vector<8x8xf32> -> vector<8x8xf32>
    %cst_95 = arith.constant 0.353553385 : f32
    %286 = vector.broadcast %cst_95 : f32 to vector<8x8xf32>
    %287 = arith.mulf %285, %286 : vector<8x8xf32>
    %cst_96 = arith.constant dense<0xFF800000> : vector<8xf32>
    %288 = vector.multi_reduction <maximumf>, %287, %cst_96 [1] : vector<8x8xf32> to vector<8xf32>
    %289 = vector.shape_cast %288 : vector<8xf32> to vector<8x1xf32>
    %290 = vector.broadcast %289 : vector<8x1xf32> to vector<8x8xf32>
    %291 = arith.subf %287, %290 : vector<8x8xf32>
    %292 = math.exp %291 : vector<8x8xf32>
    %cst_97 = arith.constant dense<0.000000e+00> : vector<8xf32>
    %293 = vector.multi_reduction <add>, %292, %cst_97 [1] : vector<8x8xf32> to vector<8xf32>
    %294 = vector.shape_cast %293 : vector<8xf32> to vector<8x1xf32>
    %295 = vector.broadcast %294 : vector<8x1xf32> to vector<8x8xf32>
    %296 = arith.divf %292, %295 : vector<8x8xf32>
    %297 = vector.extract_strided_slice %282 {offsets = [0, 0], sizes = [8, 8], strides = [1, 1]} : vector<8x32xf32> to vector<8x8xf32>
    %cst_98 = arith.constant dense<0.000000e+00> : vector<8x8xf32>
    %298 = tpu.matmul %296, %297, %cst_98 {dimension_numbers = #tpu.dot_dimension_numbers<[1], [0], [0], [1], [0, 0, 1, 1], [], []>} : vector<8x8xf32>, vector<8x8xf32>, vector<8x8xf32> -> vector<8x8xf32>
    %299 = vector.extract_strided_slice %280 {offsets = [0, 8], sizes = [8, 8], strides = [1, 1]} : vector<8x32xf32> to vector<8x8xf32>
    %300 = vector.extract_strided_slice %281 {offsets = [0, 8], sizes = [8, 8], strides = [1, 1]} : vector<8x32xf32> to vector<8x8xf32>
    %cst_99 = arith.constant dense<0.000000e+00> : vector<8x8xf32>
    %301 = tpu.matmul %299, %300, %cst_99 {dimension_numbers = #tpu.dot_dimension_numbers<[1], [1], [0], [0], [0, 0, 1, 0], [], []>} : vector<8x8xf32>, vector<8x8xf32>, vector<8x8xf32> -> vector<8x8xf32>
    %cst_100 = arith.constant 0.353553385 : f32
    %302 = vector.broadcast %cst_100 : f32 to vector<8x8xf32>
    %303 = arith.mulf %301, %302 : vector<8x8xf32>
    %cst_101 = arith.constant dense<0xFF800000> : vector<8xf32>
    %304 = vector.multi_reduction <maximumf>, %303, %cst_101 [1] : vector<8x8xf32> to vector<8xf32>
    %305 = vector.shape_cast %304 : vector<8xf32> to vector<8x1xf32>
    %306 = vector.broadcast %305 : vector<8x1xf32> to vector<8x8xf32>
    %307 = arith.subf %303, %306 : vector<8x8xf32>
    %308 = math.exp %307 : vector<8x8xf32>
    %cst_102 = arith.constant dense<0.000000e+00> : vector<8xf32>
    %309 = vector.multi_reduction <add>, %308, %cst_102 [1] : vector<8x8xf32> to vector<8xf32>
    %310 = vector.shape_cast %309 : vector<8xf32> to vector<8x1xf32>
    %311 = vector.broadcast %310 : vector<8x1xf32> to vector<8x8xf32>
    %312 = arith.divf %308, %311 : vector<8x8xf32>
    %313 = vector.extract_strided_slice %282 {offsets = [0, 8], sizes = [8, 8], strides = [1, 1]} : vector<8x32xf32> to vector<8x8xf32>
    %cst_103 = arith.constant dense<0.000000e+00> : vector<8x8xf32>
    %314 = tpu.matmul %312, %313, %cst_103 {dimension_numbers = #tpu.dot_dimension_numbers<[1], [0], [0], [1], [0, 0, 1, 1], [], []>} : vector<8x8xf32>, vector<8x8xf32>, vector<8x8xf32> -> vector<8x8xf32>
    %315 = vector.extract_strided_slice %280 {offsets = [0, 16], sizes = [8, 8], strides = [1, 1]} : vector<8x32xf32> to vector<8x8xf32>
    %316 = vector.extract_strided_slice %281 {offsets = [0, 16], sizes = [8, 8], strides = [1, 1]} : vector<8x32xf32> to vector<8x8xf32>
    %cst_104 = arith.constant dense<0.000000e+00> : vector<8x8xf32>
    %317 = tpu.matmul %315, %316, %cst_104 {dimension_numbers = #tpu.dot_dimension_numbers<[1], [1], [0], [0], [0, 0, 1, 0], [], []>} : vector<8x8xf32>, vector<8x8xf32>, vector<8x8xf32> -> vector<8x8xf32>
    %cst_105 = arith.constant 0.353553385 : f32
    %318 = vector.broadcast %cst_105 : f32 to vector<8x8xf32>
    %319 = arith.mulf %317, %318 : vector<8x8xf32>
    %cst_106 = arith.constant dense<0xFF800000> : vector<8xf32>
    %320 = vector.multi_reduction <maximumf>, %319, %cst_106 [1] : vector<8x8xf32> to vector<8xf32>
    %321 = vector.shape_cast %320 : vector<8xf32> to vector<8x1xf32>
    %322 = vector.broadcast %321 : vector<8x1xf32> to vector<8x8xf32>
    %323 = arith.subf %319, %322 : vector<8x8xf32>
    %324 = math.exp %323 : vector<8x8xf32>
    %cst_107 = arith.constant dense<0.000000e+00> : vector<8xf32>
    %325 = vector.multi_reduction <add>, %324, %cst_107 [1] : vector<8x8xf32> to vector<8xf32>
    %326 = vector.shape_cast %325 : vector<8xf32> to vector<8x1xf32>
    %327 = vector.broadcast %326 : vector<8x1xf32> to vector<8x8xf32>
    %328 = arith.divf %324, %327 : vector<8x8xf32>
    %329 = vector.extract_strided_slice %282 {offsets = [0, 16], sizes = [8, 8], strides = [1, 1]} : vector<8x32xf32> to vector<8x8xf32>
    %cst_108 = arith.constant dense<0.000000e+00> : vector<8x8xf32>
    %330 = tpu.matmul %328, %329, %cst_108 {dimension_numbers = #tpu.dot_dimension_numbers<[1], [0], [0], [1], [0, 0, 1, 1], [], []>} : vector<8x8xf32>, vector<8x8xf32>, vector<8x8xf32> -> vector<8x8xf32>
    %331 = vector.extract_strided_slice %280 {offsets = [0, 24], sizes = [8, 8], strides = [1, 1]} : vector<8x32xf32> to vector<8x8xf32>
    %332 = vector.extract_strided_slice %281 {offsets = [0, 24], sizes = [8, 8], strides = [1, 1]} : vector<8x32xf32> to vector<8x8xf32>
    %cst_109 = arith.constant dense<0.000000e+00> : vector<8x8xf32>
    %333 = tpu.matmul %331, %332, %cst_109 {dimension_numbers = #tpu.dot_dimension_numbers<[1], [1], [0], [0], [0, 0, 1, 0], [], []>} : vector<8x8xf32>, vector<8x8xf32>, vector<8x8xf32> -> vector<8x8xf32>
    %cst_110 = arith.constant 0.353553385 : f32
    %334 = vector.broadcast %cst_110 : f32 to vector<8x8xf32>
    %335 = arith.mulf %333, %334 : vector<8x8xf32>
    %cst_111 = arith.constant dense<0xFF800000> : vector<8xf32>
    %336 = vector.multi_reduction <maximumf>, %335, %cst_111 [1] : vector<8x8xf32> to vector<8xf32>
    %337 = vector.shape_cast %336 : vector<8xf32> to vector<8x1xf32>
    %338 = vector.broadcast %337 : vector<8x1xf32> to vector<8x8xf32>
    %339 = arith.subf %335, %338 : vector<8x8xf32>
    %340 = math.exp %339 : vector<8x8xf32>
    %cst_112 = arith.constant dense<0.000000e+00> : vector<8xf32>
    %341 = vector.multi_reduction <add>, %340, %cst_112 [1] : vector<8x8xf32> to vector<8xf32>
    %342 = vector.shape_cast %341 : vector<8xf32> to vector<8x1xf32>
    %343 = vector.broadcast %342 : vector<8x1xf32> to vector<8x8xf32>
    %344 = arith.divf %340, %343 : vector<8x8xf32>
    %345 = vector.extract_strided_slice %282 {offsets = [0, 24], sizes = [8, 8], strides = [1, 1]} : vector<8x32xf32> to vector<8x8xf32>
    %cst_113 = arith.constant dense<0.000000e+00> : vector<8x8xf32>
    %346 = tpu.matmul %344, %345, %cst_113 {dimension_numbers = #tpu.dot_dimension_numbers<[1], [0], [0], [1], [0, 0, 1, 1], [], []>} : vector<8x8xf32>, vector<8x8xf32>, vector<8x8xf32> -> vector<8x8xf32>
    %347 = tpu.concatenate %298, %314, %330, %346 in 1 : vector<8x8xf32>, vector<8x8xf32>, vector<8x8xf32>, vector<8x8xf32> -> vector<8x32xf32>
    %348 = tpu.concatenate %279, %347 in 0 : vector<8x32xf32>, vector<8x32xf32> -> vector<16x32xf32>
    %c0_114 = arith.constant 0 : index
    %c0_115 = arith.constant 0 : index
    %349 = vector.load %arg11[%c0_114, %c0_115] : memref<32x32xf32, #tpu.memory_space<vmem>>, vector<32x32xf32>
    %cst_116 = arith.constant dense<0.000000e+00> : vector<16x32xf32>
    %350 = tpu.matmul %348, %349, %cst_116 {dimension_numbers = #tpu.dot_dimension_numbers<[1], [0], [0], [1], [0, 0, 1, 1], [], []>} : vector<16x32xf32>, vector<32x32xf32>, vector<16x32xf32> -> vector<16x32xf32>
    %c0_117 = arith.constant 0 : index
    %c0_118 = arith.constant 0 : index
    %351 = vector.load %arg12[%c0_117, %c0_118] : memref<1x32xf32, #tpu.memory_space<vmem>>, vector<1x32xf32>
    %352 = vector.broadcast %351 : vector<1x32xf32> to vector<16x32xf32>
    %353 = arith.addf %350, %352 : vector<16x32xf32>
    %c0_119 = arith.constant 0 : index
    %c0_120 = arith.constant 0 : index
    %354 = vector.load %arg13[%c0_119, %c0_120] : memref<16x32xf32, #tpu.memory_space<vmem>>, vector<16x32xf32>
    tpu.vector_store %arg13[%c0_119, %c0_120], %353 {strides = array<i32>} : memref<16x32xf32, #tpu.memory_space<vmem>>, vector<16x32xf32>,
    return
  }
}

</mosaic_0001>

<bundles_post_ra>
// kernel: tpu_custom_call.1
= control target key start
LH: loop header
LB: loop body
LE: loop exit
PB: predicated region body
PF: predicated region fallthrough
CT: control target
= control target key end

     0   :  { %18 = vsyncpa [#allocation3], 0  ;;  %s2696_s0 = inlined_call_operand.hbm [shape: f32[16,32], index: 0, kind: input, shape index: {}]   ;;  %s2697_s1 = inlined_call_operand.hbm [shape: f32[16,32], index: 1, kind: input, shape index: {}]   ;;  %s2698_s2 = inlined_call_operand.hbm [shape: f32[16,32], index: 2, kind: input, shape index: {}]   ;;  %s2699_s3 = inlined_call_operand.hbm [shape: f32[32,96], index: 3, kind: input, shape index: {}]   ;;  %s2700_s4 = inlined_call_operand.vmem [shape: f32[1,96], index: 4, kind: input, shape index: {}]   ;;  %s2701_s5 = inlined_call_operand.hbm [shape: f32[32,32], index: 5, kind: input, shape index: {}]   ;;  %s2702_s6 = inlined_call_operand.vmem [shape: f32[1,32], index: 6, kind: input, shape index: {}]   ;;  %s2703_s7 = inlined_call_operand.hbm [shape: f32[32,32], index: 7, kind: input, shape index: {}]   ;;  %s2704_s8 = inlined_call_operand.vmem [shape: f32[1,32], index: 8, kind: input, shape index: {}]   ;;  %s2705_s9 = inlined_call_operand.hbm [shape: f32[32,64], index: 9, kind: input, shape index: {}]   ;;  %s2706_s10 = inlined_call_operand.vmem [shape: f32[1,64], index: 10, kind: input, shape index: {}]   ;;  %s2707_s11 = inlined_call_operand.hbm [shape: f32[32,32], index: 11, kind: input, shape index: {}]   ;;  %s2708_s12 = inlined_call_operand.vmem [shape: f32[1,32], index: 12, kind: input, shape index: {}]   ;;  %s2709_s13 = inlined_call_operand.hbm [shape: f32[16,32], index: 13, kind: output, shape index: {}]  }
   0x1   :  { %19 = vsyncpa [#allocation6], 0 }
   0x2   :  { %20 = vsyncpa [#allocation9], 0 }
   0x3   :  { %21 = vsyncpa [#allocation12], 0 }
   0x4   :  { %22 = vsyncpa [#allocation15], 0 }
   0x5   :  { %23 = vsyncpa [#allocation4], 0  ;;  %s41_s27 = sshll.u32 %s2697_s1, 4  ;;  %s2224_s28 = smov [#allocation5]   ;;  %s42_s27 = int_to_ptr.hbm [resolvable:$true] %s41_s27 }
   0x6   :  { %s43_s29 = sshll.u32 %s2224_s28, 4  ;;  %s67_s15 = sshll.u32 %s2699_s3, 4  ;;  %s44_s29 = int_to_ptr.vmem [resolvable:$true] %s43_s29  ;;  %s68_s15 = int_to_ptr.hbm [resolvable:$true] %s67_s15 }
   0x7   :  { %s2225_s16 = smov 128   ;;  %s2226_s17 = smov 8  }
   0x8   :  { %49 = dma.hbm_to_vmem [thread:$0]  %s42_s27, 256, %s44_s29, [#allocation6], %s2225_s16, %s2225_s16, %s2226_s17  }
   0x9   :  { %s2227_s18 = smov [#allocation8]   ;;  %s97_s1 = sshll.u32 %s2703_s7, 4  ;;  %s98_s1 = int_to_ptr.hbm [resolvable:$true] %s97_s1 }
   0xa   :  { %s69_s19 = sshll.u32 %s2227_s18, 4  ;;  %s28_s23 = sshll.u32 %s2696_s0, 4  ;;  %s70_s19 = int_to_ptr.vmem [resolvable:$true] %s69_s19  ;;  %s29_s23 = int_to_ptr.hbm [resolvable:$true] %s28_s23 }
   0xb   :  { %75 = dma.hbm_to_vmem [thread:$0]  %s68_s15, 512, %s70_s19, [#allocation9], %s2225_s16, %s2225_s16, %s2226_s17  }
   0xc   :  { %s2228_s24 = smov [#allocation11]   ;;  %s2229_s26 = smov [#allocation2]  }
   0xd   :  { %s99_s25 = sshll.u32 %s2228_s24, 4  ;;  %s30_s7 = sshll.u32 %s2229_s26, 4  ;;  %s100_s25 = int_to_ptr.vmem [resolvable:$true] %s99_s25  ;;  %s31_s7 = int_to_ptr.vmem [resolvable:$true] %s30_s7 }
   0xe   :  { %105 = dma.hbm_to_vmem [thread:$0]  %s98_s1, 512, %s100_s25, [#allocation12], %s2225_s16, %s2225_s16, %s2226_s17  }
   0xf   :  { %s54_s29 = sshll.u32 %s2698_s2, 4  ;;  %s82_s14 = sshll.u32 %s2701_s5, 4  ;;  %s55_s29 = int_to_ptr.hbm [resolvable:$true] %s54_s29  ;;  %s83_s14 = int_to_ptr.hbm [resolvable:$true] %s82_s14 }
  0x10   :  { %36 = dma.hbm_to_vmem [thread:$0]  %s29_s23, 256, %s31_s7, [#allocation3], %s2225_s16, %s2225_s16, %s2226_s17  }
  0x11   :  { %s2230_s15 = smov [#allocation7]   ;;  %s2231_s19 = smov [#allocation10]  }
  0x12   :  { %s56_s18 = sshll.u32 %s2230_s15, 4  ;;  %s84_s2 = sshll.u32 %s2231_s19, 4  ;;  %s57_s18 = int_to_ptr.vmem [resolvable:$true] %s56_s18  ;;  %s85_s2 = int_to_ptr.vmem [resolvable:$true] %s84_s2 }
  0x13   :  { %62 = dma.hbm_to_vmem [thread:$0]  %s55_s29, 256, %s57_s18, [#allocation6], %s2225_s16, %s2225_s16, %s2226_s17  }
  0x14   :  { %s112_s1 = sshll.u32 %s2705_s9, 4  ;;  %s127_s22 = sshll.u32 %s2707_s11, 4  ;;  %s113_s1 = int_to_ptr.hbm [resolvable:$true] %s112_s1  ;;  %s128_s22 = int_to_ptr.hbm [resolvable:$true] %s127_s22 }
  0x15   :  { %90 = dma.hbm_to_vmem [thread:$0]  %s83_s14, 512, %s85_s2, [#allocation9], %s2225_s16, %s2225_s16, %s2226_s17  }
  0x16   :  { %s2232_s23 = smov [#allocation13]   ;;  %s2233_s25 = smov [#allocation14]  }
  0x17   :  { %s114_s24 = sshll.u32 %s2232_s23, 4  ;;  %s129_s9 = sshll.u32 %s2233_s25, 4  ;;  %s115_s24 = int_to_ptr.vmem [resolvable:$true] %s114_s24  ;;  %s130_s9 = int_to_ptr.vmem [resolvable:$true] %s129_s9 }
  0x18   :  { %120 = dma.hbm_to_vmem [thread:$0]  %s113_s1, 512, %s115_s24, [#allocation12], %s2225_s16, %s2225_s16, %s2226_s17  }
  0x19   :  { %135 = dma.hbm_to_vmem [thread:$0]  %s128_s22, 512, %s130_s9, [#allocation15], %s2225_s16, %s2225_s16, %s2226_s17  }
  0x1a   :  { %2212 = dma.done.wait [#allocation3], 256  }
  0x1b   :  { %2213 = vsyncadd [#allocation3], 4294967040 }
  0x1c   :  { %2214 = dma.done.wait [#allocation6], 512  }
  0x1d   :  { %2215 = vsyncadd [#allocation6], 4294966784 }
  0x1e   :  { %2216 = dma.done.wait [#allocation9], 1024  }
  0x1f   :  { %2217 = vsyncadd [#allocation9], 4294966272 }
  0x20   :  { %2218 = dma.done.wait [#allocation12], 1024  }
  0x21   :  { %2219 = vsyncadd [#allocation12], 4294966272 }
  0x22   :  { %2220 = dma.done.wait [#allocation15], 512  }
  0x23   :  { %2221 = vsyncadd [#allocation15], 4294966784  ;;  %v179_v0 = vld [vmem:[#allocation8 + $0x18] sm:$0xff]  ;;  %v178_v1 = vld [vmem:[#allocation8 + $0x10] sm:$0xff]  ;;  %vm184_vm0 = vcmask 261120   ;;  %s2234_s7 = smov 88  }
  0x24   :  { %203 = vmatpush.msra.mxu0 %v179_v0  ;;  %v170_v2 = vld [vmem:[#allocation2] sm:$0xff]  ;;  %v177_v4 = vld [vmem:[#allocation8 + $0x8] sm:$0xff]  ;;  %v176_v5 = vld [vmem:[#allocation8] sm:$0xff]  ;;  %s2235_s27 = smov 96   ;;  %s2236_s28 = smov 120   ;;  %vm217_vm1 = vcmask 64512  }
  0x25   :  { %v172_v3 = vld [vmem:[#allocation7] sm:$0xff]  ;;  %s2238_s29 = smov 104   ;;  %s2239_s0 = smov 64   ;;  %v171_v38 = vld [vmem:[#allocation2 + $0x8] sm:$0xff] }
  0x26   :  { %204 = vmatpush.msra.mxu0 %v178_v1  ;;  %v2367_v6 = vadd.f32 %v172_v3, %v170_v2  ;;  %v2374_v7 = vld [vmem:[%s2700_s4] ss:$0 sm:$0xff]  ;;  %s2237_s4 = smov 56   ;;  %s2240_s30 = smov 80   ;;  %v173_v39 = vld [vmem:[#allocation7 + $0x8] sm:$0xff] }
  0x27   :  { %s2241_s14 = smov 112   ;;  %v2407_v40 = vadd.f32 %v173_v39, %v171_v38  ;;  %s2242_s15 = smov 72  }
  0x28   :  { %205 = vmatpush.msra.mxu0 %v177_v4  ;;  %s2243_s18 = smov 48   ;;  %s2244_s19 = smov 40  }
  0x29   :  { %s2245_s2 = smov 24   ;;  %s2246_s20 = smov 16  }
  0x2a   :  { %206 = vmatpush.msra.mxu0 %v176_v5 }
  0x2b   :  { %1824 = vmatmul.msk.f32.vlgmr.msra.gmra.mxu0 %vm184_vm0, %v2367_v6 }
  0x33   :  { %1825 = vmatmul.msk.f32.gmra.mxu0 %vm184_vm0, %v2407_v40 }
  0xa8   :  { %v208_v8 = vpop.f32.mrf.mxu0 }
  0xa9   :  { %v2377_v9 = vadd.f32 %v2374_v7, %v208_v8 }
  0xab   :  { %295 = vrot.lane.b32.xlu2 %v2377_v9, %s2234_s7  ;;  %215 = vrot.lane.b32.xlu0 %v2377_v9, %s2235_s27 }
  0xb0   :  { %v211_v54 = vpop.f32.mrf.mxu0 }
  0xb1   :  { %v2418_v55 = vadd.f32 %v2374_v7, %v211_v54 }
  0xb3   :  { %293 = vrot.lane.b32.xlu2 %v2377_v9, %s2236_s28 }
 0x105   :  { %v296_v31 = vpop.permute.xlu2 %295 }
 0x10d   :  { %v294_v35 = vpop.permute.xlu2 %293 }
 0x11d   :  { %v216_v10 = vpop.permute.xlu0 %215 }
 0x11e   :  { %1826 = vmatpush.xpose.msk.msra.mxu1 %vm217_vm1, %v216_v10 }
 0x121   :  { %1827 = vmatmul.msk.f32.vlgmr.msra.gmra.mxu1 %vm217_vm1, %v2377_v9 }
 0x19e   :  { %v239_v11 = vpop.f32.mrf.mxu1 }
 0x19f   :  { %v242_v12 = vmul.f32 0.35355338, %v239_v11 }
 0x1a1   :  { %v243_v13 = vsel %vm217_vm1, %v242_v12, -inf }
 0x1a2   :  { %244 = vmax.xlane.f32.xlu0 %v243_v13 }
 0x1b6   :  { %346 = vrot.lane.b32.xlu0 %v2377_v9, %s2237_s4 }
 0x1be   :  { %451 = vrot.lane.b32.xlu0 %v2377_v9, %s2238_s29 }
 0x215   :  { %v245_v14 = vpop.xlane.xlu0 %244 }
 0x216   :  { %v246_v15 = vsub.f32 %v242_v12, %v245_v14 }
 0x218   :  { %v247_v16 = vmul.f32 1.442695, %v246_v15 }
 0x21a   :  { %1926 = vpow2.f32 %v247_v16 }
 0x220   :  { %v1927_v17 = vpop.eup %1926 }
 0x221   :  { %v249_v18 = vsel %vm217_vm1, %v1927_v17, 0.0 }
 0x222   :  { %250 = vadd.xlane.f32.xlu1 %v249_v18 }
 0x228   :  { %v347_v19 = vpop.permute.xlu0 %346 }
 0x229   :  { %367 = vmatpush.msra.mxu2 %v347_v19 }
 0x230   :  { %v2415_v47 = vpop.permute.xlu0 %451 }
 0x23b   :  { %267 = vrot.lane.b32.xlu1 %v2377_v9, %s2239_s0 }
 0x243   :  { %374 = vrot.lane.b32.xlu1 %v2377_v9, %s2240_s30 }
 0x24b   :  { %372 = vrot.lane.b32.xlu1 %v2377_v9, %s2241_s14 }
 0x295   :  { %v251_v20 = vpop.xlane.xlu1 %250 }
 0x296   :  { %1928 = vrcp.f32 %v251_v20  ;;  %v263_v26 = vand.u32 2147483648, %v251_v20  ;;  %vm257_vm3 = vweird.f32 %v251_v20  ;;  %v261_v27 = vand.u32 2147483647, %v251_v20 }
 0x298   :  { %v264_v29 = vor.u32 1.1754944e-38, %v263_v26  ;;  %vm262_vm5 = vcmp.eq.f32.partialorder %v261_v27, 8.507059e+37 }
 0x29c   :  { %v1929_v21 = vpop.eup %1928 }
 0x29d   :  { %v253_v22 = vmul.f32 %v1929_v21, %v251_v20  ;;  %vm258_vm2 = vweird.f32 %v1929_v21 }
 0x29e   :  { %vm259_vm4 = vmor %vm257_vm3, %vm258_vm2 }
 0x29f   :  { %v254_v23 = vsub.f32 1.0, %v253_v22 }
 0x2a1   :  { %v255_v24 = vmul.f32 %v1929_v21, %v254_v23 }
 0x2a3   :  { %v256_v25 = vadd.f32 %v1929_v21, %v255_v24 }
 0x2a5   :  { %v260_v28 = vsel %vm259_vm4, %v1929_v21, %v256_v25 }
 0x2a6   :  { %v265_v30 = vsel %vm262_vm5, %v264_v29, %v260_v28 }
 0x2a7   :  { %v266_v33 = vmul.f32 %v1927_v17, %v265_v30 }
 0x2ad   :  { %v268_v32 = vpop.permute.xlu1 %267 }
 0x2ae   :  { %288 = vmatpush.msra.mxu3 %v268_v32 }
 0x2af   :  { %1828 = vmatmul.msk.f32.vlgmr.msra.gmra.mxu3 %vm217_vm1, %v266_v33 }
 0x2b0   :  { %1829 = vmatpush.xpose.msk.msrb.mxu3 %vm217_vm1, %v296_v31 }
 0x2b5   :  { %v375_v34 = vpop.permute.xlu1 %374 }
 0x2b6   :  { %1832 = vmatpush.xpose.msk.msrb.mxu1 %vm217_vm1, %v375_v34 }
 0x2b7   :  { %1830 = vmatmul.msk.f32.vlgmr.msrb.gmra.mxu3 %vm217_vm1, %v294_v35 }
 0x2bd   :  { %v373_v36 = vpop.permute.xlu1 %372 }
 0x2be   :  { %1833 = vmatmul.msk.f32.vlgmr.msrb.gmra.mxu1 %vm217_vm1, %v373_v36 }
 0x332   :  { %v2405_v37 = vpop.f32.mrf.mxu3 }
 0x33a   :  { %v318_v41 = vpop.f32.mrf.mxu3 }
 0x33b   :  { %v321_v42 = vmul.f32 0.35355338, %v318_v41  ;;  %v397_v43 = vpop.f32.mrf.mxu1 }
 0x33c   :  { %v400_v44 = vmul.f32 0.35355338, %v397_v43 }
 0x33d   :  { %v322_v45 = vsel %vm217_vm1, %v321_v42, -inf }
 0x33e   :  { %323 = vmax.xlane.f32.xlu2 %v322_v45  ;;  %v401_v46 = vsel %vm217_vm1, %v400_v44, -inf }
 0x33f   :  { %402 = vmax.xlane.f32.xlu0 %v401_v46 }
 0x353   :  { %627 = vrot.lane.b32.xlu0 %v2418_v55, %s2234_s7 }
 0x356   :  { %453 = vrot.lane.b32.xlu2 %v2377_v9, %s2242_s15 }
 0x35b   :  { %704 = vrot.lane.b32.xlu0 %v2418_v55, %s2241_s14 }
 0x3b1   :  { %v324_v48 = vpop.xlane.xlu2 %323 }
 0x3b2   :  { %v325_v49 = vsub.f32 %v321_v42, %v324_v48  ;;  %v403_v50 = vpop.xlane.xlu0 %402 }
 0x3b3   :  { %v404_v51 = vsub.f32 %v400_v44, %v403_v50 }
 0x3b4   :  { %v326_v52 = vmul.f32 1.442695, %v325_v49 }
 0x3b5   :  { %v405_v53 = vmul.f32 1.442695, %v404_v51 }
 0x3b6   :  { %1930 = vpow2.f32 %v326_v52 }
 0x3b7   :  { %1932 = vpow2.f32 %v405_v53 }
 0x3b9   :  { %v454_v56 = vpop.permute.xlu2 %453 }
 0x3ba   :  { %1835 = vmatpush.xpose.msk.msrb.mxu2 %vm217_vm1, %v454_v56 }
 0x3bc   :  { %v1931_v57 = vpop.eup %1930 }
 0x3bd   :  { %v1933_v58 = vpop.eup %1932  ;;  %v328_v59 = vsel %vm217_vm1, %v1931_v57, 0.0 }
 0x3be   :  { %329 = vadd.xlane.f32.xlu1 %v328_v59  ;;  %v407_v60 = vsel %vm217_vm1, %v1933_v58, 0.0 }
 0x3bf   :  { %408 = vadd.xlane.f32.xlu2 %v407_v60 }
 0x3c5   :  { %v628_v19 = vpop.permute.xlu0 %627 }
 0x3cd   :  { %v705_v50 = vpop.permute.xlu0 %704 }
 0x3d7   :  { %425 = vrot.lane.b32.xlu1 %v2377_v9, %s2243_s18 }
 0x3df   :  { %548 = vrot.lane.b32.xlu1 %v2418_v55, %s2235_s27 }
 0x3e7   :  { %625 = vrot.lane.b32.xlu1 %v2418_v55, %s2236_s28 }
 0x3ef   :  { %785 = vrot.lane.b32.xlu1 %v2418_v55, %s2242_s15 }
 0x3f7   :  { %783 = vrot.lane.b32.xlu1 %v2418_v55, %s2238_s29 }
 0x3ff   :  { %504 = vrot.lane.b32.xlu1 %v2377_v9, %s2244_s19 }
 0x431   :  { %v330_v61 = vpop.xlane.xlu1 %329 }
 0x432   :  { %1934 = vrcp.f32 %v330_v61  ;;  %v409_v62 = vpop.xlane.xlu2 %408  ;;  %v342_v4 = vand.u32 2147483648, %v330_v61  ;;  %v340_v8 = vand.u32 2147483647, %v330_v61  ;;  %vm336_vm7 = vweird.f32 %v330_v61 }
 0x433   :  { %1936 = vrcp.f32 %v409_v62  ;;  %v421_v13 = vand.u32 2147483648, %v409_v62  ;;  %vm415_vm10 = vweird.f32 %v409_v62  ;;  %v419_v14 = vand.u32 2147483647, %v409_v62 }
 0x434   :  { %v343_v12 = vor.u32 1.1754944e-38, %v342_v4  ;;  %vm341_vm11 = vcmp.eq.f32.partialorder %v340_v8, 8.507059e+37 }
 0x435   :  { %v422_v20 = vor.u32 1.1754944e-38, %v421_v13  ;;  %vm420_vm13 = vcmp.eq.f32.partialorder %v419_v14, 8.507059e+37 }
 0x438   :  { %v1935_v63 = vpop.eup %1934 }
 0x439   :  { %v1937_v0 = vpop.eup %1936  ;;  %v332_v1 = vmul.f32 %v1935_v63, %v330_v61  ;;  %vm337_vm6 = vweird.f32 %v1935_v63 }
 0x43a   :  { %v411_v2 = vmul.f32 %v1937_v0, %v409_v62  ;;  %vm416_vm8 = vweird.f32 %v1937_v0  ;;  %vm338_vm9 = vmor %vm336_vm7, %vm337_vm6 }
 0x43b   :  { %v333_v3 = vsub.f32 1.0, %v332_v1  ;;  %vm417_vm12 = vmor %vm415_vm10, %vm416_vm8 }
 0x43c   :  { %v412_v5 = vsub.f32 1.0, %v411_v2 }
 0x43d   :  { %v334_v7 = vmul.f32 %v1935_v63, %v333_v3 }
 0x43e   :  { %v413_v10 = vmul.f32 %v1937_v0, %v412_v5 }
 0x43f   :  { %v335_v11 = vadd.f32 %v1935_v63, %v334_v7 }
 0x440   :  { %v414_v9 = vadd.f32 %v1937_v0, %v413_v10 }
 0x441   :  { %v339_v15 = vsel %vm338_vm9, %v1935_v63, %v335_v11 }
 0x442   :  { %v344_v16 = vsel %vm341_vm11, %v343_v12, %v339_v15  ;;  %v418_v17 = vsel %vm417_vm12, %v1937_v0, %v414_v9 }
 0x443   :  { %v345_v18 = vmul.f32 %v1931_v57, %v344_v16  ;;  %v423_v21 = vsel %vm420_vm13, %v422_v20, %v418_v17 }
 0x444   :  { %v424_v23 = vmul.f32 %v1933_v58, %v423_v21 }
 0x445   :  { %1831 = vmatmul.msk.f32.vlgmr.msra.gmra.mxu2 %vm217_vm1, %v345_v18 }
 0x446   :  { %1841 = vmatpush.xpose.msk.msra.mxu2 %vm217_vm1, %v628_v19 }
 0x449   :  { %v426_v22 = vpop.permute.xlu1 %425 }
 0x44a   :  { %446 = vmatpush.msra.mxu3 %v426_v22 }
 0x44b   :  { %1834 = vmatmul.msk.f32.vlgmr.msra.gmra.mxu3 %vm217_vm1, %v424_v23 }
 0x44d   :  { %1836 = vmatmul.msk.f32.vlgmr.msrb.gmra.mxu2 %vm217_vm1, %v2415_v47 }
 0x451   :  { %v549_v24 = vpop.permute.xlu1 %548 }
 0x452   :  { %1838 = vmatpush.xpose.msk.msrb.mxu3 %vm217_vm1, %v549_v24 }
 0x455   :  { %1839 = vmatmul.msk.f32.vlgmr.msrb.gmra.mxu3 %vm217_vm1, %v2418_v55 }
 0x459   :  { %v626_v25 = vpop.permute.xlu1 %625 }
 0x45a   :  { %1842 = vmatmul.msk.f32.vlgmr.msra.gmra.mxu2 %vm217_vm1, %v626_v25 }
 0x461   :  { %v786_v26 = vpop.permute.xlu1 %785 }
 0x462   :  { %1847 = vmatpush.xpose.msk.msrb.mxu2 %vm217_vm1, %v786_v26 }
 0x469   :  { %v784_v27 = vpop.permute.xlu1 %783 }
 0x46a   :  { %1848 = vmatmul.msk.f32.vlgmr.msrb.gmra.mxu2 %vm217_vm1, %v784_v27 }
 0x471   :  { %v505_v28 = vpop.permute.xlu1 %504 }
 0x472   :  { %525 = vmatpush.msra.mxu1 %v505_v28 }
 0x4c8   :  { %v2450_v29 = vpop.f32.mrf.mxu2 }
 0x4ce   :  { %v2456_v36 = vpop.f32.mrf.mxu3 }
 0x4d0   :  { %v476_v30 = vpop.f32.mrf.mxu2 }
 0x4d1   :  { %v479_v31 = vmul.f32 0.35355338, %v476_v30 }
 0x4d3   :  { %v480_v32 = vsel %vm217_vm1, %v479_v31, -inf }
 0x4d4   :  { %481 = vmax.xlane.f32.xlu2 %v480_v32 }
 0x4d8   :  { %v571_v38 = vpop.f32.mrf.mxu3 }
 0x4d9   :  { %v574_v39 = vmul.f32 0.35355338, %v571_v38 }
 0x4db   :  { %v575_v41 = vsel %vm217_vm1, %v574_v39, -inf }
 0x4dd   :  { %v650_v33 = vpop.f32.mrf.mxu2 }
 0x4de   :  { %v653_v34 = vmul.f32 0.35355338, %v650_v33 }
 0x4e0   :  { %v654_v35 = vsel %vm217_vm1, %v653_v34, -inf }
 0x4e1   :  { %655 = vmax.xlane.f32.xlu1 %v654_v35 }
 0x4ec   :  { %706 = vrot.lane.b32.xlu2 %v2418_v55, %s2240_s30 }
 0x4ed   :  { %v808_v42 = vpop.f32.mrf.mxu2 }
 0x4ee   :  { %v811_v43 = vmul.f32 0.35355338, %v808_v42 }
 0x4f0   :  { %v812_v44 = vsel %vm217_vm1, %v811_v43, -inf }
 0x515   :  { %576 = vmax.xlane.f32.xlu2 %v575_v41 }
 0x51d   :  { %813 = vmax.xlane.f32.xlu2 %v812_v44 }
 0x547   :  { %v482_v45 = vpop.xlane.xlu2 %481 }
 0x548   :  { %v483_v46 = vsub.f32 %v479_v31, %v482_v45 }
 0x54a   :  { %v484_v47 = vmul.f32 1.442695, %v483_v46 }
 0x54c   :  { %1938 = vpow2.f32 %v484_v47 }
 0x54f   :  { %v707_v48 = vpop.permute.xlu2 %706 }
 0x550   :  { %1844 = vmatpush.xpose.msk.msra.mxu3 %vm217_vm1, %v707_v48 }
 0x552   :  { %v1939_v49 = vpop.eup %1938 }
 0x553   :  { %1845 = vmatmul.msk.f32.vlgmr.msra.gmra.mxu3 %vm217_vm1, %v705_v50  ;;  %v486_v51 = vsel %vm217_vm1, %v1939_v49, 0.0 }
 0x554   :  { %487 = vadd.xlane.f32.xlu0 %v486_v51  ;;  %v656_v52 = vpop.xlane.xlu1 %655 }
 0x555   :  { %v657_v53 = vsub.f32 %v653_v34, %v656_v52 }
 0x557   :  { %v658_v54 = vmul.f32 1.442695, %v657_v53 }
 0x559   :  { %1940 = vpow2.f32 %v658_v54 }
 0x55f   :  { %v2463_v56 = vpop.eup %1940 }
 0x560   :  { %v660_v57 = vsel %vm217_vm1, %v2463_v56, 0.0 }
 0x561   :  { %661 = vadd.xlane.f32.xlu1 %v660_v57 }
 0x588   :  { %v577_v58 = vpop.xlane.xlu2 %576 }
 0x589   :  { %v578_v3 = vsub.f32 %v574_v39, %v577_v58 }
 0x58b   :  { %v579_v10 = vmul.f32 1.442695, %v578_v3 }
 0x590   :  { %v814_v59 = vpop.xlane.xlu2 %813 }
 0x591   :  { %v815_v60 = vsub.f32 %v811_v43, %v814_v59  ;;  %v880_v59 = vld [vmem:[#allocation10 + $0x18] sm:$0xff] }
 0x592   :  { %903 = vmatpush.msrb.mxu3 %v880_v59 }
 0x593   :  { %v816_v61 = vmul.f32 1.442695, %v815_v60  ;;  %v879_v60 = vld [vmem:[#allocation10 + $0x10] sm:$0xff] }
 0x594   :  { %904 = vmatpush.msrb.mxu3 %v879_v60 }
 0x595   :  { %1942 = vpow2.f32 %v816_v61  ;;  %v878_v61 = vld [vmem:[#allocation10 + $0x8] sm:$0xff] }
 0x596   :  { %905 = vmatpush.msrb.mxu3 %v878_v61 }
 0x59b   :  { %v2467_v62 = vpop.eup %1942 }
 0x59c   :  { %v818_v63 = vsel %vm217_vm1, %v2467_v62, 0.0 }
 0x59d   :  { %819 = vadd.xlane.f32.xlu1 %v818_v63 }
 0x5c7   :  { %v488_v0 = vpop.xlane.xlu0 %487 }
 0x5c8   :  { %1944 = vrcp.f32 %v488_v0  ;;  %v500_v5 = vand.u32 2147483648, %v488_v0  ;;  %v498_v8 = vand.u32 2147483647, %v488_v0  ;;  %vm494_vm15 = vweird.f32 %v488_v0 }
 0x5c9   :  { %1946 = vpow2.f32 %v579_v10 }
 0x5ca   :  { %v501_v12 = vor.u32 1.1754944e-38, %v500_v5  ;;  %vm499_vm3 = vcmp.eq.f32.partialorder %v498_v8, 8.507059e+37 }
 0x5ce   :  { %v1945_v1 = vpop.eup %1944 }
 0x5cf   :  { %v490_v2 = vmul.f32 %v1945_v1, %v488_v0  ;;  %vm495_vm14 = vweird.f32 %v1945_v1  ;;  %v1947_v18 = vpop.eup %1946 }
 0x5d0   :  { %vm496_vm2 = vmor %vm494_vm15, %vm495_vm14  ;;  %v581_v19 = vsel %vm217_vm1, %v1947_v18, 0.0 }
 0x5d1   :  { %v491_v4 = vsub.f32 1.0, %v490_v2 }
 0x5d3   :  { %v492_v7 = vmul.f32 %v1945_v1, %v491_v4 }
 0x5d4   :  { %v662_v24 = vpop.xlane.xlu1 %661 }
 0x5d5   :  { %v493_v11 = vadd.f32 %v1945_v1, %v492_v7  ;;  %vm668_vm7 = vweird.f32 %v662_v24  ;;  %v674_v45 = vand.u32 2147483648, %v662_v24  ;;  %v672_v48 = vand.u32 2147483647, %v662_v24 }
 0x5d6   :  { %v729_v9 = vpop.f32.mrf.mxu3 }
 0x5d7   :  { %v497_v13 = vsel %vm496_vm2, %v1945_v1, %v493_v11  ;;  %v732_v14 = vmul.f32 0.35355338, %v729_v9  ;;  %v675_v51 = vor.u32 1.1754944e-38, %v674_v45  ;;  %vm673_vm11 = vcmp.eq.f32.partialorder %v672_v48, 8.507059e+37 }
 0x5d8   :  { %v502_v15 = vsel %vm499_vm3, %v501_v12, %v497_v13  ;;  %vm543_vm2 = vcmask 130048   ;;  %vm545_vm3 = vcmask 195584  }
 0x5d9   :  { %v733_v16 = vsel %vm217_vm1, %v732_v14, -inf  ;;  %v503_v17 = vmul.f32 %v1939_v49, %v502_v15 }
 0x5da   :  { %734 = vmax.xlane.f32.xlu0 %v733_v16 }
 0x5db   :  { %1837 = vmatmul.msk.f32.vlgmr.msra.gmra.mxu1 %vm217_vm1, %v503_v17 }
 0x5e2   :  { %582 = vadd.xlane.f32.xlu0 %v581_v19 }
 0x5f6   :  { %531 = vrot.lane.b32.xlu0 %v2450_v29, %s2226_s17 }
 0x5fe   :  { %599 = vrot.lane.b32.xlu0 %v2418_v55, %s2239_s0 }
 0x606   :  { %678 = vrot.lane.b32.xlu0 %v2418_v55, %s2237_s4 }
 0x610   :  { %v820_v58 = vpop.xlane.xlu1 %819 }
 0x611   :  { %vm826_vm12 = vweird.f32 %v820_v58  ;;  %v832_v2 = vand.u32 2147483648, %v820_v58  ;;  %v830_v3 = vand.u32 2147483647, %v820_v58 }
 0x613   :  { %v833_v5 = vor.u32 1.1754944e-38, %v832_v2  ;;  %vm831_vm15 = vcmp.eq.f32.partialorder %v830_v3, 8.507059e+37 }
 0x64d   :  { %v735_v20 = vpop.xlane.xlu0 %734 }
 0x64e   :  { %v736_v21 = vsub.f32 %v732_v14, %v735_v20 }
 0x650   :  { %v737_v22 = vmul.f32 1.442695, %v736_v21 }
 0x652   :  { %1948 = vpow2.f32 %v737_v22 }
 0x655   :  { %v583_v23 = vpop.xlane.xlu0 %582 }
 0x656   :  { %1950 = vrcp.f32 %v583_v23  ;;  %v595_v38 = vand.u32 2147483648, %v583_v23  ;;  %vm589_vm5 = vweird.f32 %v583_v23  ;;  %v593_v39 = vand.u32 2147483647, %v583_v23 }
 0x657   :  { %1952 = vrcp.f32 %v662_v24 }
 0x658   :  { %v2480_v25 = vpop.eup %1948  ;;  %v527_v26 = vpop.f32.mrf.mxu1  ;;  %v596_v44 = vor.u32 1.1754944e-38, %v595_v38  ;;  %vm594_vm9 = vcmp.eq.f32.partialorder %v593_v39, 8.507059e+37  ;;  %1954 = vrcp.f32 %v820_v58 }
 0x659   :  { %539 = vrot.lane.b32.xlu1 %v527_v26, %s2245_s2  ;;  %v739_v27 = vsel %vm217_vm1, %v2480_v25, 0.0 }
 0x65a   :  { %740 = vadd.xlane.f32.xlu2 %v739_v27 }
 0x65c   :  { %v1951_v28 = vpop.eup %1950 }
 0x65d   :  { %v585_v29 = vmul.f32 %v1951_v28, %v583_v23  ;;  %v1953_v30 = vpop.eup %1952  ;;  %vm590_vm4 = vweird.f32 %v1951_v28 }
 0x65e   :  { %v664_v32 = vmul.f32 %v1953_v30, %v662_v24  ;;  %vm591_vm6 = vmor %vm589_vm5, %vm590_vm4  ;;  %vm669_vm8 = vweird.f32 %v1953_v30  ;;  %v1955_v63 = vpop.eup %1954 }
 0x65f   :  { %v586_v31 = vsub.f32 1.0, %v585_v29  ;;  %vm670_vm10 = vmor %vm668_vm7, %vm669_vm8  ;;  %v822_v0 = vmul.f32 %v1955_v63, %v820_v58  ;;  %vm827_vm13 = vweird.f32 %v1955_v63 }
 0x660   :  { %v665_v34 = vsub.f32 1.0, %v664_v32  ;;  %vm828_vm14 = vmor %vm826_vm12, %vm827_vm13 }
 0x661   :  { %836 = vrot.lane.b32.xlu1 %v2418_v55, %s2244_s19  ;;  %v587_v33 = vmul.f32 %v1951_v28, %v586_v31  ;;  %v823_v1 = vsub.f32 1.0, %v822_v0 }
 0x662   :  { %v666_v42 = vmul.f32 %v1953_v30, %v665_v34 }
 0x663   :  { %v588_v35 = vadd.f32 %v1951_v28, %v587_v33 }
 0x664   :  { %v667_v47 = vadd.f32 %v1953_v30, %v666_v42 }
 0x665   :  { %v592_v43 = vsel %vm591_vm6, %v1951_v28, %v588_v35  ;;  %v2247_v35 = vmov 256.0  }
 0x666   :  { %v597_v46 = vsel %vm594_vm9, %v596_v44, %v592_v43  ;;  %v671_v52 = vsel %vm670_vm10, %v1953_v30, %v667_v47  ;;  %v1922_v30 = vld [vmem:[%s2702_s6] ss:$0 sm:$0xff] }
 0x667   :  { %v598_v50 = vmul.f32 %v1947_v18, %v597_v46  ;;  %v676_v53 = vsel %vm673_vm11, %v675_v51, %v671_v52 }
 0x668   :  { %v532_v41 = vpop.permute.xlu0 %531  ;;  %v677_v57 = vmul.f32 %v2463_v56, %v676_v53  ;;  %v824_v56 = vmul.f32 %v1955_v63, %v823_v1 }
 0x669   :  { %v542_v13 = vsel %vm217_vm1, %v2405_v37, %v532_v41 }
 0x670   :  { %v600_v49 = vpop.permute.xlu0 %599 }
 0x671   :  { %620 = vmatpush.msrb.mxu0 %v600_v49 }
 0x672   :  { %535 = vrot.lane.b32.xlu2 %v2456_v36, %s2246_s20  ;;  %1840 = vmatmul.msk.f32.vlgmr.msrb.gmra.mxu0 %vm217_vm1, %v598_v50  ;;  %v877_v36 = vld [vmem:[#allocation10] sm:$0xff] }
 0x673   :  { %906 = vmatpush.msrb.mxu3 %v877_v36 }
 0x678   :  { %v679_v54 = vpop.permute.xlu0 %678 }
 0x679   :  { %699 = vmatpush.msrb.mxu1 %v679_v54 }
 0x67a   :  { %757 = vrot.lane.b32.xlu2 %v2418_v55, %s2243_s18  ;;  %1843 = vmatmul.msk.f32.vlgmr.msrb.gmra.mxu1 %vm217_vm1, %v677_v57  ;;  %v825_v55 = vadd.f32 %v1955_v63, %v824_v56 }
 0x67c   :  { %v829_v7 = vsel %vm828_vm14, %v1955_v63, %v825_v55 }
 0x67d   :  { %v834_v10 = vsel %vm831_vm15, %v833_v5, %v829_v7 }
 0x67e   :  { %v835_v12 = vmul.f32 %v2467_v62, %v834_v10  ;;  %v1070_v10 = vld [vmem:[#allocation13 + $0x18] sm:$0xff] }
 0x67f   :  { %1093 = vmatpush.msra.mxu2 %v1070_v10 }
 0x6cb   :  { %v540_v4 = vpop.permute.xlu1 %539 }
 0x6cd   :  { %v741_v8 = vpop.xlane.xlu2 %740 }
 0x6ce   :  { %1956 = vrcp.f32 %v741_v8  ;;  %v753_v19 = vand.u32 2147483648, %v741_v8  ;;  %v751_v62 = vand.u32 2147483647, %v741_v8  ;;  %vm747_vm5 = vweird.f32 %v741_v8 }
 0x6cf   :  { %1958 = vrcp.f32 %v2247_v35 }
 0x6d0   :  { %v754_v22 = vor.u32 1.1754944e-38, %v753_v19  ;;  %vm752_vm7 = vcmp.eq.f32.partialorder %v751_v62, 8.507059e+37 }
 0x6d3   :  { %v837_v11 = vpop.permute.xlu1 %836 }
 0x6d4   :  { %v1957_v9 = vpop.eup %1956  ;;  %857 = vmatpush.msra.mxu1 %v837_v11  ;;  %v1069_v11 = vld [vmem:[#allocation13 + $0x10] sm:$0xff] }
 0x6d5   :  { %v743_v14 = vmul.f32 %v1957_v9, %v741_v8  ;;  %v536_v15 = vpop.permute.xlu2 %535  ;;  %1849 = vmatmul.msk.f32.vlgmr.msra.gmra.mxu1 %vm217_vm1, %v835_v12  ;;  %vm748_vm4 = vweird.f32 %v1957_v9  ;;  %v1959_v39 = vpop.eup %1958  ;;  %1094 = vmatpush.msra.mxu2 %v1069_v11 }
 0x6d6   :  { %v544_v16 = vsel %vm543_vm2, %v542_v13, %v536_v15  ;;  %vm749_vm6 = vmor %vm747_vm5, %vm748_vm4  ;;  %v927_v41 = vmul.f32 256.0, %v1959_v39  ;;  %vm931_vm8 = vweird.f32 %v1959_v39 }
 0x6d7   :  { %v744_v17 = vsub.f32 1.0, %v743_v14  ;;  %v546_v18 = vsel %vm545_vm3, %v544_v16, %v540_v4 }
 0x6d8   :  { %1850 = vmatmul.msk.f32.vlgmr.msrb.gmra.mxu3 %vm184_vm0, %v546_v18  ;;  %v928_v47 = vsub.f32 1.0, %v927_v41 }
 0x6d9   :  { %v745_v20 = vmul.f32 %v1957_v9, %v744_v17 }
 0x6da   :  { %v929_v50 = vmul.f32 %v1959_v39, %v928_v47 }
 0x6db   :  { %v746_v21 = vadd.f32 %v1957_v9, %v745_v20 }
 0x6dc   :  { %v930_v53 = vadd.f32 %v1959_v39, %v929_v50 }
 0x6dd   :  { %v750_v37 = vsel %vm749_vm6, %v1957_v9, %v746_v21  ;;  %v758_v23 = vpop.permute.xlu2 %757 }
 0x6de   :  { %v755_v24 = vsel %vm752_vm7, %v754_v22, %v750_v37  ;;  %778 = vmatpush.msra.mxu0 %v758_v23  ;;  %v932_v58 = vsel %vm931_vm8, %v1959_v39, %v930_v53  ;;  %v1068_v23 = vld [vmem:[#allocation13 + $0x8] sm:$0xff] }
 0x6df   :  { %v756_v26 = vmul.f32 %v2480_v25, %v755_v24  ;;  %1095 = vmatpush.msra.mxu2 %v1068_v23  ;;  %v1067_v24 = vld [vmem:[#allocation13] sm:$0xff] }
 0x6e1   :  { %1846 = vmatmul.msk.f32.vlgmr.msra.gmra.mxu0 %vm217_vm1, %v756_v26  ;;  %1096 = vmatpush.msra.mxu2 %v1067_v24  ;;  %v1033_v26 = vld [vmem:[#allocation11 + $0x18] sm:$0xff] }
 0x6e2   :  { %1056 = vmatpush.msrb.mxu0 %v1033_v26 }
 0x6ef   :  { %v622_v29 = vpop.f32.mrf.mxu0 }
 0x6f7   :  { %v701_v27 = vpop.f32.mrf.mxu1 }
 0x6f8   :  { %863 = vrot.lane.b32.xlu2 %v701_v27, %s2226_s17  ;;  %v1032_v27 = vld [vmem:[#allocation11 + $0x10] sm:$0xff] }
 0x6f9   :  { %1057 = vmatpush.msrb.mxu0 %v1032_v27 }
 0x752   :  { %v859_v28 = vpop.f32.mrf.mxu1  ;;  %v864_v38 = vpop.permute.xlu2 %863 }
 0x753   :  { %871 = vrot.lane.b32.xlu2 %v859_v28, %s2245_s2  ;;  %v874_v42 = vsel %vm217_vm1, %v622_v29, %v864_v38  ;;  %v1031_v28 = vld [vmem:[#allocation11 + $0x8] sm:$0xff]  ;;  %v1030_v29 = vld [vmem:[#allocation11] sm:$0xff]  ;;  %v1924_v38 = vld [vmem:[%s2704_s8] ss:$0 sm:$0xff] }
 0x754   :  { %1058 = vmatpush.msrb.mxu0 %v1031_v28 }
 0x756   :  { %1059 = vmatpush.msrb.mxu0 %v1030_v29 }
 0x75b   :  { %v908_v31 = vpop.f32.mrf.mxu3 }
 0x75c   :  { %v909_v32 = vadd.f32 %v1922_v30, %v908_v31 }
 0x75e   :  { %v780_v33 = vpop.f32.mrf.mxu0  ;;  %v914_v34 = vadd.f32 %v909_v32, %v2367_v6 }
 0x75f   :  { %867 = vrot.lane.b32.xlu1 %v780_v33, %s2246_s20 }
 0x760   :  { %v916_v25 = vsel %vm184_vm0, %v914_v34, 0.0 }
 0x761   :  { %917 = vadd.xlane.f32.xlu0 %v916_v25 }
 0x7ad   :  { %v872_v44 = vpop.permute.xlu2 %871 }
 0x7d1   :  { %v868_v43 = vpop.permute.xlu1 %867 }
 0x7d2   :  { %v875_v45 = vsel %vm543_vm2, %v874_v42, %v868_v43 }
 0x7d3   :  { %v876_v46 = vsel %vm545_vm3, %v875_v45, %v872_v44 }
 0x7d4   :  { %1851 = vmatmul.msk.f32.gmra.mxu3 %vm184_vm0, %v876_v46  ;;  %v918_v6 = vpop.xlane.xlu0 %917  ;;  %v1923_v46 = vld [vmem:[%s2706_s10] ss:$0 sm:$0xff] }
 0x7d5   :  { %v919_v48 = vrot.slane %v918_v6, 4 }
 0x7d7   :  { %v920_v49 = vadd.f32 %v919_v48, %v918_v6 }
 0x7d9   :  { %v921_v51 = vrot.slane %v920_v49, 2 }
 0x7db   :  { %v922_v52 = vadd.f32 %v921_v51, %v920_v49  ;;  %v1029_v51 = vld [vmem:[#allocation5 + $0x8] sm:$0xff] }
 0x7dd   :  { %v923_v54 = vrot.slane %v922_v52, 1 }
 0x7df   :  { %v924_v57 = vadd.f32 %v923_v54, %v922_v52 }
 0x7e1   :  { %1882 = vpush %v924_v57 }
 0x7e2   :  { %1884 = vpush %v932_v58 }
 0x812   :  { %s1883_s6 = spop %1882 }
 0x813   :  { %s2515_s5 = spop %1884 }
 0x814   :  { %s934_s3 = smul.f32 %s2515_s5, %s1883_s6 }
 0x816   :  { %v935_v59 = vstv %s934_s3 }
 0x817   :  { %v936_v60 = vsub.f32 %v914_v34, %v935_v59 }
 0x819   :  { %v937_v61 = vmul.f32 %v936_v60, %v936_v60 }
 0x81b   :  { %v938_v36 = vsel %vm184_vm0, %v937_v61, 0.0 }
 0x81c   :  { %939 = vadd.xlane.f32.xlu1 %v938_v36 }
 0x857   :  { %v911_v63 = vpop.f32.mrf.mxu3 }
 0x858   :  { %v912_v0 = vadd.f32 %v1922_v30, %v911_v63  ;;  %v1028_v30 = vld [vmem:[#allocation5] sm:$0xff] }
 0x859   :  { %1852 = vmatmul.msk.f32.vlgmr.msrb.gmra.mxu0 %vm184_vm0, %v1028_v30 }
 0x85a   :  { %v915_v1 = vadd.f32 %v912_v0, %v2407_v40 }
 0x85c   :  { %v972_v56 = vsel %vm184_vm0, %v915_v1, 0.0 }
 0x85d   :  { %973 = vadd.xlane.f32.xlu2 %v972_v56 }
 0x861   :  { %1853 = vmatmul.msk.f32.gmra.mxu0 %vm184_vm0, %v1029_v51 }
 0x88f   :  { %v940_v2 = vpop.xlane.xlu1 %939 }
 0x890   :  { %v941_v55 = vrot.slane %v940_v2, 4 }
 0x892   :  { %v942_v3 = vadd.f32 %v941_v55, %v940_v2 }
 0x894   :  { %v943_v4 = vrot.slane %v942_v3, 2 }
 0x896   :  { %v944_v5 = vadd.f32 %v943_v4, %v942_v3 }
 0x898   :  { %v945_v7 = vrot.slane %v944_v5, 1 }
 0x89a   :  { %v946_v8 = vadd.f32 %v945_v7, %v944_v5 }
 0x89c   :  { %1886 = vpush %v946_v8 }
 0x8cd   :  { %s1887_s22 = spop %1886 }
 0x8ce   :  { %s956_s23 = smul.f32 %s1887_s22, %s2515_s5 }
 0x8d0   :  { %s957_s24 = sadd.f32 1e-05, %s956_s23  ;;  %v974_v40 = vpop.xlane.xlu2 %973 }
 0x8d1   :  { %v975_v12 = vrot.slane %v974_v40, 4 }
 0x8d2   :  { %v958_v9 = vstv %s957_s24 }
 0x8d3   :  { %1960 = vrsqrt.f32 %v958_v9  ;;  %v976_v13 = vadd.f32 %v975_v12, %v974_v40  ;;  %vm965_vm10 = vweird.f32 %v958_v9 }
 0x8d5   :  { %v977_v14 = vrot.slane %v976_v13, 2 }
 0x8d6   :  { %v1061_v39 = vpop.f32.mrf.mxu0 }
 0x8d7   :  { %v978_v18 = vadd.f32 %v977_v14, %v976_v13  ;;  %v1062_v41 = vadd.f32 %v1924_v38, %v1061_v39 }
 0x8d9   :  { %v1961_v15 = vpop.eup %1960  ;;  %v979_v62 = vrot.slane %v978_v18, 1  ;;  %1181 = vrot.lane.b32.xlu1 %v1062_v41, %s2236_s28 }
 0x8da   :  { %v960_v16 = vmul.f32 %v1961_v15, %v958_v9  ;;  %vm966_vm9 = vweird.f32 %v1961_v15 }
 0x8db   :  { %vm967_vm11 = vmor %vm965_vm10, %vm966_vm9  ;;  %v980_v37 = vadd.f32 %v979_v62, %v978_v18 }
 0x8dc   :  { %v961_v17 = vmul.f32 %v1961_v15, %v960_v16 }
 0x8de   :  { %v962_v19 = vmul.f32 0.5, %v961_v17  ;;  %v1064_v4 = vpop.f32.mrf.mxu0 }
 0x8df   :  { %v1065_v5 = vadd.f32 %v1924_v38, %v1064_v4 }
 0x8e0   :  { %v963_v20 = vsub.f32 1.5, %v962_v19 }
 0x8e1   :  { %1339 = vrot.lane.b32.xlu1 %v1062_v41, %s2238_s29 }
 0x8e2   :  { %v964_v21 = vmul.f32 %v1961_v15, %v963_v20 }
 0x8e4   :  { %v968_v22 = vsel %vm967_vm11, %v1961_v15, %v964_v21 }
 0x8e5   :  { %1888 = vpush %v968_v22 }
 0x8e6   :  { %1890 = vpush %v980_v37 }
 0x916   :  { %s1889_s25 = spop %1888 }
 0x917   :  { %v970_v31 = vstv %s1889_s25  ;;  %s1891_s9 = spop %1890 }
 0x918   :  { %v971_v32 = vmul.f32 %v970_v31, %v936_v60  ;;  %s990_s11 = smul.f32 %s1891_s9, %s2515_s5 }
 0x91a   :  { %v991_v33 = vstv %s990_s11  ;;  %1854 = vmatmul.msk.f32.vlgmr.msra.gmra.mxu2 %vm184_vm0, %v971_v32 }
 0x91b   :  { %v992_v34 = vsub.f32 %v915_v1, %v991_v33 }
 0x91d   :  { %v993_v25 = vmul.f32 %v992_v34, %v992_v34 }
 0x91f   :  { %v994_v35 = vsel %vm184_vm0, %v993_v25, 0.0 }
 0x920   :  { %995 = vadd.xlane.f32.xlu0 %v994_v35 }
 0x94b   :  { %v1182_v0 = vpop.permute.xlu1 %1181 }
 0x953   :  { %v1340_v2 = vpop.permute.xlu1 %1339 }
 0x993   :  { %v996_v42 = vpop.xlane.xlu0 %995 }
 0x994   :  { %v997_v43 = vrot.slane %v996_v42, 4 }
 0x996   :  { %v998_v44 = vadd.f32 %v997_v43, %v996_v42 }
 0x998   :  { %v999_v45 = vrot.slane %v998_v44, 2 }
 0x99a   :  { %v1000_v47 = vadd.f32 %v999_v45, %v998_v44 }
 0x99c   :  { %v1001_v6 = vrot.slane %v1000_v47, 1 }
 0x99d   :  { %v1098_v48 = vpop.f32.mrf.mxu2 }
 0x99e   :  { %v2534_v49 = vadd.f32 %v1923_v46, %v1098_v48  ;;  %v1002_v50 = vadd.f32 %v1001_v6, %v1000_v47 }
 0x9a0   :  { %1892 = vpush %v1002_v50  ;;  %1262 = vrot.lane.b32.xlu2 %v2534_v49, %s2241_s14  ;;  %1183 = vrot.lane.b32.xlu0 %v2534_v49, %s2236_s28 }
 0x9a1   :  { %1856 = vmatpush.xpose.msk.msrb.mxu1 %vm217_vm1, %v2534_v49 }
 0x9a4   :  { %1857 = vmatmul.msk.f32.vlgmr.msrb.gmra.mxu1 %vm217_vm1, %v1062_v41 }
 0x9a8   :  { %1341 = vrot.lane.b32.xlu0 %v2534_v49, %s2238_s29 }
 0x9b0   :  { %1260 = vrot.lane.b32.xlu0 %v1062_v41, %s2241_s14 }
 0x9b8   :  { %1510 = vrot.lane.b32.xlu0 %v1065_v5, %s2236_s28 }
 0x9c0   :  { %1589 = vrot.lane.b32.xlu0 %v1065_v5, %s2241_s14 }
 0x9d1   :  { %s1893_s8 = spop %1892 }
 0x9d2   :  { %s1012_s10 = smul.f32 %s1893_s8, %s2515_s5 }
 0x9d4   :  { %s1013_s19 = sadd.f32 1e-05, %s1012_s10 }
 0x9d6   :  { %v1014_v52 = vstv %s1013_s19 }
 0x9d7   :  { %1962 = vrsqrt.f32 %v1014_v52  ;;  %vm1021_vm13 = vweird.f32 %v1014_v52 }
 0x9dd   :  { %v1963_v53 = vpop.eup %1962 }
 0x9de   :  { %v1016_v54 = vmul.f32 %v1963_v53, %v1014_v52  ;;  %vm1022_vm12 = vweird.f32 %v1963_v53 }
 0x9df   :  { %vm1023_vm14 = vmor %vm1021_vm13, %vm1022_vm12 }
 0x9e0   :  { %v1017_v57 = vmul.f32 %v1963_v53, %v1016_v54 }
 0x9e2   :  { %v1018_v58 = vmul.f32 0.5, %v1017_v57 }
 0x9e4   :  { %v1019_v59 = vsub.f32 1.5, %v1018_v58 }
 0x9e6   :  { %v1020_v60 = vmul.f32 %v1963_v53, %v1019_v59 }
 0x9e8   :  { %v1024_v61 = vsel %vm1023_vm14, %v1963_v53, %v1020_v60 }
 0x9e9   :  { %1894 = vpush %v1024_v61 }
 0x9fa   :  { %v1263_v36 = vpop.permute.xlu2 %1262 }
 0x9fb   :  { %1862 = vmatpush.xpose.msk.msrb.mxu2 %vm217_vm1, %v1263_v36 }
 0xa12   :  { %v1184_v63 = vpop.permute.xlu0 %1183 }
 0xa13   :  { %1859 = vmatpush.xpose.msk.msra.mxu3 %vm217_vm1, %v1184_v63 }
 0xa16   :  { %1860 = vmatmul.msk.f32.vlgmr.msra.gmra.mxu3 %vm217_vm1, %v1182_v0 }
 0xa1a   :  { %s1895_s21 = spop %1894  ;;  %v1342_v1 = vpop.permute.xlu0 %1341 }
 0xa1b   :  { %v1026_v56 = vstv %s1895_s21  ;;  %1865 = vmatpush.xpose.msk.msrb.mxu3 %vm217_vm1, %v1342_v1 }
 0xa1c   :  { %v1027_v55 = vmul.f32 %v1026_v56, %v992_v34 }
 0xa1e   :  { %1855 = vmatmul.msk.f32.gmra.mxu2 %vm184_vm0, %v1027_v55  ;;  %1866 = vmatmul.msk.f32.vlgmr.msrb.gmra.mxu3 %vm217_vm1, %v1340_v2 }
 0xa21   :  { %v1127_v9 = vpop.f32.mrf.mxu1 }
 0xa22   :  { %v1261_v3 = vpop.permute.xlu0 %1260  ;;  %v1130_v14 = vmul.f32 0.35355338, %v1127_v9 }
 0xa24   :  { %v1131_v17 = vsel %vm217_vm1, %v1130_v14, -inf }
 0xa26   :  { %1863 = vmatmul.msk.f32.vlgmr.msrb.gmra.mxu2 %vm217_vm1, %v1261_v3 }
 0xa2a   :  { %v1511_v20 = vpop.permute.xlu0 %1510 }
 0xa32   :  { %v1590_v22 = vpop.permute.xlu0 %1589 }
 0xa99   :  { %v1206_v7 = vpop.f32.mrf.mxu3 }
 0xa9a   :  { %v1209_v8 = vmul.f32 0.35355338, %v1206_v7 }
 0xa9c   :  { %v1210_v10 = vsel %vm217_vm1, %v1209_v8, -inf }
 0xa9d   :  { %1211 = vmax.xlane.f32.xlu0 %v1210_v10 }
 0xaa1   :  { %v1101_v11 = vpop.f32.mrf.mxu2  ;;  %v1364_v16 = vpop.f32.mrf.mxu3 }
 0xaa2   :  { %v2558_v40 = vadd.f32 %v1923_v46, %v1101_v11  ;;  %v1367_v18 = vmul.f32 0.35355338, %v1364_v16 }
 0xaa4   :  { %1591 = vrot.lane.b32.xlu1 %v2558_v40, %s2241_s14  ;;  %1512 = vrot.lane.b32.xlu2 %v2558_v40, %s2236_s28  ;;  %v1368_v19 = vsel %vm217_vm1, %v1367_v18, -inf  ;;  %s2248_s28 = smov [#allocation16]  }
 0xaa5   :  { %1868 = vmatpush.xpose.msk.msra.mxu2 %vm217_vm1, %v2558_v40 }
 0xaa8   :  { %1869 = vmatmul.msk.f32.vlgmr.msra.gmra.mxu2 %vm217_vm1, %v1065_v5 }
 0xaa9   :  { %v1285_v12 = vpop.f32.mrf.mxu2 }
 0xaaa   :  { %v1288_v13 = vmul.f32 0.35355338, %v1285_v12 }
 0xaac   :  { %1668 = vrot.lane.b32.xlu1 %v1065_v5, %s2238_s29  ;;  %1670 = vrot.lane.b32.xlu2 %v2558_v40, %s2238_s29  ;;  %v1289_v15 = vsel %vm217_vm1, %v1288_v13, -inf  ;;  %s1805_s29 = sshll.u32 %s2248_s28, 4  ;;  %s1806_s29 = int_to_ptr.vmem [resolvable:$true] %s1805_s29 }
 0xad5   :  { %1132 = vmax.xlane.f32.xlu2 %v1131_v17 }
 0xad6   :  { %1290 = vmax.xlane.f32.xlu1 %v1289_v15 }
 0xadd   :  { %1369 = vmax.xlane.f32.xlu2 %v1368_v19 }
 0xafe   :  { %v1513_v62 = vpop.permute.xlu2 %1512 }
 0xaff   :  { %1871 = vmatpush.xpose.msk.msra.mxu3 %vm217_vm1, %v1513_v62 }
 0xb02   :  { %1872 = vmatmul.msk.f32.vlgmr.msra.gmra.mxu3 %vm217_vm1, %v1511_v20 }
 0xb06   :  { %v1671_v21 = vpop.permute.xlu2 %1670 }
 0xb07   :  { %1877 = vmatpush.xpose.msk.msrb.mxu3 %vm217_vm1, %v1671_v21 }
 0xb10   :  { %v1212_v37 = vpop.xlane.xlu0 %1211 }
 0xb11   :  { %v1213_v23 = vsub.f32 %v1209_v8, %v1212_v37 }
 0xb13   :  { %v1214_v24 = vmul.f32 1.442695, %v1213_v23 }
 0xb15   :  { %1964 = vpow2.f32 %v1214_v24 }
 0xb16   :  { %v1592_v26 = vpop.permute.xlu1 %1591 }
 0xb17   :  { %1874 = vmatpush.xpose.msk.msrb.mxu2 %vm217_vm1, %v1592_v26 }
 0xb1a   :  { %1875 = vmatmul.msk.f32.vlgmr.msrb.gmra.mxu2 %vm217_vm1, %v1590_v22 }
 0xb1b   :  { %v2578_v27 = vpop.eup %1964 }
 0xb1c   :  { %v1216_v28 = vsel %vm217_vm1, %v2578_v27, 0.0 }
 0xb1d   :  { %1217 = vadd.xlane.f32.xlu2 %v1216_v28 }
 0xb1e   :  { %v1669_v29 = vpop.permute.xlu1 %1668 }
 0xb1f   :  { %1878 = vmatmul.msk.f32.vlgmr.msrb.gmra.mxu3 %vm217_vm1, %v1669_v29 }
 0xb2b   :  { %v1456_v30 = vpop.f32.mrf.mxu2 }
 0xb2c   :  { %v1459_v31 = vmul.f32 0.35355338, %v1456_v30 }
 0xb2e   :  { %v1460_v32 = vsel %vm217_vm1, %v1459_v31, -inf }
 0xb2f   :  { %1461 = vmax.xlane.f32.xlu0 %v1460_v32 }
 0xb48   :  { %v1133_v39 = vpop.xlane.xlu2 %1132 }
 0xb49   :  { %v1291_v33 = vpop.xlane.xlu1 %1290  ;;  %v1134_v41 = vsub.f32 %v1130_v14, %v1133_v39 }
 0xb4a   :  { %v1292_v34 = vsub.f32 %v1288_v13, %v1291_v33 }
 0xb4b   :  { %v1135_v42 = vmul.f32 1.442695, %v1134_v41 }
 0xb4c   :  { %v1293_v25 = vmul.f32 1.442695, %v1292_v34 }
 0xb4e   :  { %1966 = vpow2.f32 %v1293_v25 }
 0xb4f   :  { %1968 = vpow2.f32 %v1135_v42 }
 0xb50   :  { %v1370_v43 = vpop.xlane.xlu2 %1369 }
 0xb51   :  { %v1371_v46 = vsub.f32 %v1367_v18, %v1370_v43 }
 0xb53   :  { %v1372_v6 = vmul.f32 1.442695, %v1371_v46 }
 0xb54   :  { %v2584_v35 = vpop.eup %1966 }
 0xb55   :  { %v1295_v38 = vsel %vm217_vm1, %v2584_v35, 0.0  ;;  %v2589_v48 = vpop.eup %1968  ;;  %1970 = vpow2.f32 %v1372_v6 }
 0xb56   :  { %1296 = vadd.xlane.f32.xlu0 %v1295_v38  ;;  %v1137_v50 = vsel %vm217_vm1, %v2589_v48, 0.0 }
 0xb5b   :  { %v2593_v51 = vpop.eup %1970 }
 0xb5c   :  { %v1374_v52 = vsel %vm217_vm1, %v2593_v51, 0.0 }
 0xb85   :  { %v1535_v44 = vpop.f32.mrf.mxu3 }
 0xb86   :  { %v1538_v45 = vmul.f32 0.35355338, %v1535_v44 }
 0xb88   :  { %v1539_v47 = vsel %vm217_vm1, %v1538_v45, -inf }
 0xb89   :  { %1540 = vmax.xlane.f32.xlu1 %v1539_v47 }
 0xb90   :  { %v1218_v56 = vpop.xlane.xlu2 %1217 }
 0xb91   :  { %1138 = vadd.xlane.f32.xlu1 %v1137_v50  ;;  %vm1224_vm15 = vweird.f32 %v1218_v56  ;;  %v1230_v18 = vand.u32 2147483648, %v1218_v56  ;;  %v1228_v19 = vand.u32 2147483647, %v1218_v56 }
 0xb93   :  { %v1231_v23 = vor.u32 1.1754944e-38, %v1230_v18  ;;  %vm1229_vm6 = vcmp.eq.f32.partialorder %v1228_v19, 8.507059e+37 }
 0xb99   :  { %1375 = vadd.xlane.f32.xlu1 %v1374_v52 }
 0xb9d   :  { %v1614_v53 = vpop.f32.mrf.mxu2 }
 0xb9e   :  { %v1617_v54 = vmul.f32 0.35355338, %v1614_v53 }
 0xba0   :  { %v1618_v57 = vsel %vm217_vm1, %v1617_v54, -inf }
 0xba1   :  { %1619 = vmax.xlane.f32.xlu2 %v1618_v57 }
 0xba2   :  { %v1693_v58 = vpop.f32.mrf.mxu3  ;;  %v1462_v61 = vpop.xlane.xlu0 %1461 }
 0xba3   :  { %v2598_v59 = vmul.f32 0.35355338, %v1693_v58  ;;  %v1463_v36 = vsub.f32 %v1459_v31, %v1462_v61 }
 0xba5   :  { %v1697_v60 = vsel %vm217_vm1, %v2598_v59, -inf  ;;  %v1464_v63 = vmul.f32 1.442695, %v1463_v36 }
 0xba6   :  { %1698 = vmax.xlane.f32.xlu0 %v1697_v60 }
 0xba7   :  { %1972 = vpow2.f32 %v1464_v63 }
 0xba8   :  { %1974 = vrcp.f32 %v1218_v56 }
 0xbad   :  { %v2612_v0 = vpop.eup %1972 }
 0xbae   :  { %v1466_v1 = vsel %vm217_vm1, %v2612_v0, 0.0  ;;  %v1975_v4 = vpop.eup %1974 }
 0xbaf   :  { %v1220_v7 = vmul.f32 %v1975_v4, %v1218_v56  ;;  %vm1225_vm4 = vweird.f32 %v1975_v4 }
 0xbb0   :  { %vm1226_vm5 = vmor %vm1224_vm15, %vm1225_vm4 }
 0xbb1   :  { %v1221_v11 = vsub.f32 1.0, %v1220_v7 }
 0xbb2   :  { %1155 = vrot.lane.b32.xlu1 %v2534_v49, %s2235_s27 }
 0xbb3   :  { %v1222_v13 = vmul.f32 %v1975_v4, %v1221_v11 }
 0xbb5   :  { %v1223_v16 = vadd.f32 %v1975_v4, %v1222_v13 }
 0xbb7   :  { %v1227_v21 = vsel %vm1226_vm5, %v1975_v4, %v1223_v16 }
 0xbb8   :  { %v1232_v26 = vsel %vm1229_vm6, %v1231_v23, %v1227_v21 }
 0xbb9   :  { %1234 = vrot.lane.b32.xlu2 %v2534_v49, %s2234_s7  ;;  %v1233_v38 = vmul.f32 %v2578_v27, %v1232_v26 }
 0xbba   :  { %1392 = vrot.lane.b32.xlu1 %v2534_v49, %s2242_s15 }
 0xbc2   :  { %1563 = vrot.lane.b32.xlu1 %v2558_v40, %s2234_s7 }
 0xbc9   :  { %v2624_v15 = vpop.xlane.xlu0 %1296 }
 0xbca   :  { %1721 = vrot.lane.b32.xlu1 %v2558_v40, %s2242_s15  ;;  %v1307_v23 = vand.u32 2147483647, %v2624_v15  ;;  %s1807_s15 = sshll.u32 %s2709_s13, 4  ;;  %s1808_s15 = int_to_ptr.hbm [resolvable:$true] %s1807_s15 }
 0xbe2   :  { %1467 = vadd.xlane.f32.xlu2 %v1466_v1 }
 0xbfa   :  { %1484 = vrot.lane.b32.xlu2 %v2558_v40, %s2235_s27 }
 0xbfc   :  { %v1541_v2 = vpop.xlane.xlu1 %1540 }
 0xbfd   :  { %v1542_v55 = vsub.f32 %v1538_v45, %v1541_v2 }
 0xbff   :  { %v1543_v3 = vmul.f32 1.442695, %v1542_v55 }
 0xc01   :  { %1976 = vpow2.f32 %v1543_v3 }
 0xc02   :  { %1642 = vrot.lane.b32.xlu2 %v2558_v40, %s2240_s30 }
 0xc04   :  { %v1139_v5 = vpop.xlane.xlu1 %1138 }
 0xc05   :  { %1978 = vrcp.f32 %v1139_v5  ;;  %v1151_v32 = vand.u32 2147483648, %v1139_v5  ;;  %vm1145_vm8 = vweird.f32 %v1139_v5  ;;  %v1149_v33 = vand.u32 2147483647, %v1139_v5 }
 0xc07   :  { %v2620_v8 = vpop.eup %1976  ;;  %v1152_v43 = vor.u32 1.1754944e-38, %v1151_v32  ;;  %vm1150_vm10 = vcmp.eq.f32.partialorder %v1149_v33, 8.507059e+37 }
 0xc08   :  { %v1545_v10 = vsel %vm217_vm1, %v2620_v8, 0.0 }
 0xc09   :  { %1546 = vadd.xlane.f32.xlu0 %v1545_v10 }
 0xc0b   :  { %v1979_v12 = vpop.eup %1978 }
 0xc0c   :  { %v1376_v9 = vpop.xlane.xlu1 %1375  ;;  %v1141_v14 = vmul.f32 %v1979_v12, %v1139_v5  ;;  %vm1146_vm7 = vweird.f32 %v1979_v12 }
 0xc0d   :  { %1980 = vrcp.f32 %v1376_v9  ;;  %vm1147_vm9 = vmor %vm1145_vm8, %vm1146_vm7  ;;  %v1388_v47 = vand.u32 2147483648, %v1376_v9  ;;  %vm1382_vm12 = vweird.f32 %v1376_v9  ;;  %v1386_v27 = vand.u32 2147483647, %v1376_v9 }
 0xc0e   :  { %v1142_v40 = vsub.f32 1.0, %v1141_v14  ;;  %vm1303_vm8 = vweird.f32 %v2624_v15 }
 0xc0f   :  { %vm1387_vm14 = vcmp.eq.f32.partialorder %v1386_v27, 8.507059e+37 }
 0xc10   :  { %v1143_v22 = vmul.f32 %v1979_v12, %v1142_v40 }
 0xc12   :  { %v1144_v29 = vadd.f32 %v1979_v12, %v1143_v22  ;;  %v1309_v22 = vand.u32 2147483648, %v2624_v15 }
 0xc13   :  { %v1981_v17 = vpop.eup %1980 }
 0xc14   :  { %v1620_v20 = vpop.xlane.xlu2 %1619  ;;  %v1378_v37 = vmul.f32 %v1981_v17, %v1376_v9  ;;  %v1148_v39 = vsel %vm1147_vm9, %v1979_v12, %v1144_v29  ;;  %vm1383_vm11 = vweird.f32 %v1981_v17 }
 0xc15   :  { %v1621_v62 = vsub.f32 %v1617_v54, %v1620_v20  ;;  %v1153_v45 = vsel %vm1150_vm10, %v1152_v43, %v1148_v39  ;;  %vm1384_vm13 = vmor %vm1382_vm12, %vm1383_vm11  ;;  %v1389_v54 = vor.u32 1.1754944e-38, %v1388_v47  ;;  %vm1308_vm12 = vcmp.eq.f32.partialorder %v1307_v23, 8.507059e+37 }
 0xc16   :  { %v1379_v30 = vsub.f32 1.0, %v1378_v37  ;;  %v1154_v50 = vmul.f32 %v2589_v48, %v1153_v45 }
 0xc17   :  { %v1622_v24 = vmul.f32 1.442695, %v1621_v62 }
 0xc18   :  { %v1380_v41 = vmul.f32 %v1981_v17, %v1379_v30 }
 0xc19   :  { %1982 = vpow2.f32 %v1622_v24  ;;  %v1699_v28 = vpop.xlane.xlu0 %1698 }
 0xc1a   :  { %v1700_v31 = vsub.f32 %v2598_v59, %v1699_v28  ;;  %v1381_v46 = vadd.f32 %v1981_v17, %v1380_v41 }
 0xc1c   :  { %v1701_v34 = vmul.f32 1.442695, %v1700_v31  ;;  %v1235_v25 = vpop.permute.xlu2 %1234  ;;  %v1385_v53 = vsel %vm1384_vm13, %v1981_v17, %v1381_v46 }
 0xc1d   :  { %1255 = vmatpush.msra.mxu0 %v1235_v25  ;;  %v1390_v58 = vsel %vm1387_vm14, %v1389_v54, %v1385_v53 }
 0xc1e   :  { %1861 = vmatmul.msk.f32.vlgmr.msra.gmra.mxu0 %vm217_vm1, %v1233_v38  ;;  %1984 = vpow2.f32 %v1701_v34  ;;  %v1391_v60 = vmul.f32 %v2593_v51, %v1390_v58  ;;  %v1310_v34 = vor.u32 1.1754944e-38, %v1309_v22 }
 0xc1f   :  { %v2629_v42 = vpop.eup %1982 }
 0xc20   :  { %v1624_v44 = vsel %vm217_vm1, %v2629_v42, 0.0 }
 0xc21   :  { %1625 = vadd.xlane.f32.xlu0 %v1624_v44 }
 0xc24   :  { %v1156_v6 = vpop.permute.xlu1 %1155  ;;  %v2634_v52 = vpop.eup %1984 }
 0xc25   :  { %1176 = vmatpush.msra.mxu1 %v1156_v6  ;;  %v1703_v57 = vsel %vm217_vm1, %v2634_v52, 0.0 }
 0xc26   :  { %1858 = vmatmul.msk.f32.vlgmr.msra.gmra.mxu1 %vm217_vm1, %v1154_v50 }
 0xc29   :  { %1704 = vadd.xlane.f32.xlu0 %v1703_v57 }
 0xc2c   :  { %v1393_v59 = vpop.permute.xlu1 %1392 }
 0xc2d   :  { %1413 = vmatpush.msrb.mxu0 %v1393_v59 }
 0xc2e   :  { %1867 = vmatmul.msk.f32.vlgmr.msrb.gmra.mxu0 %vm217_vm1, %v1391_v60 }
 0xc34   :  { %v1564_v48 = vpop.permute.xlu1 %1563 }
 0xc35   :  { %1584 = vmatpush.msra.mxu0 %v1564_v48 }
 0xc3c   :  { %v1722_v61 = vpop.permute.xlu1 %1721 }
 0xc3d   :  { %1313 = vrot.lane.b32.xlu0 %v2534_v49, %s2240_s30  ;;  %1742 = vmatpush.msrb.mxu0 %v1722_v61 }
 0xc55   :  { %v1468_v11 = vpop.xlane.xlu2 %1467 }
 0xc56   :  { %v1480_v46 = vand.u32 2147483648, %v1468_v11  ;;  %v1478_v27 = vand.u32 2147483647, %v1468_v11 }
 0xc58   :  { %v1481_v57 = vor.u32 1.1754944e-38, %v1480_v46 }
 0xc5d   :  { %v1485_v28 = vpop.permute.xlu2 %1484 }
 0xc65   :  { %v1643_v58 = vpop.permute.xlu2 %1642 }
 0xc7c   :  { %v1547_v36 = vpop.xlane.xlu0 %1546 }
 0xc7d   :  { %1986 = vrcp.f32 %v1547_v36  ;;  %v1559_v2 = vand.u32 2147483648, %v1547_v36  ;;  %v1557_v3 = vand.u32 2147483647, %v1547_v36  ;;  %vm1553_vm4 = vweird.f32 %v1547_v36 }
 0xc7e   :  { %1988 = vrcp.f32 %v2624_v15 }
 0xc7f   :  { %v1560_v4 = vor.u32 1.1754944e-38, %v1559_v2  ;;  %vm1558_vm6 = vcmp.eq.f32.partialorder %v1557_v3, 8.507059e+37  ;;  %1990 = vrcp.f32 %v1468_v11 }
 0xc83   :  { %v1987_v63 = vpop.eup %1986 }
 0xc84   :  { %v1549_v1 = vmul.f32 %v1987_v63, %v1547_v36  ;;  %vm1554_vm15 = vweird.f32 %v1987_v63  ;;  %v1989_v12 = vpop.eup %1988 }
 0xc85   :  { %vm1555_vm5 = vmor %vm1553_vm4, %vm1554_vm15  ;;  %v1299_v9 = vmul.f32 %v1989_v12, %v2624_v15  ;;  %v1991_v40 = vpop.eup %1990  ;;  %vm1304_vm7 = vweird.f32 %v1989_v12  ;;  %vm1474_vm4 = vweird.f32 %v1468_v11 }
 0xc86   :  { %v1550_v56 = vsub.f32 1.0, %v1549_v1  ;;  %v1470_v17 = vmul.f32 %v1991_v40, %v1468_v11  ;;  %vm2654_vm9 = vmor %vm1303_vm8, %vm1304_vm7  ;;  %vm1475_vm15 = vweird.f32 %v1991_v40 }
 0xc87   :  { %v1300_v16 = vsub.f32 1.0, %v1299_v9 }
 0xc88   :  { %v1551_v55 = vmul.f32 %v1987_v63, %v1550_v56  ;;  %v1471_v62 = vsub.f32 1.0, %v1470_v17 }
 0xc8a   :  { %v1552_v51 = vadd.f32 %v1987_v63, %v1551_v55  ;;  %v1472_v32 = vmul.f32 %v1991_v40, %v1471_v62 }
 0xc8c   :  { %v1556_v5 = vsel %vm1555_vm5, %v1987_v63, %v1552_v51  ;;  %v1473_v43 = vadd.f32 %v1991_v40, %v1472_v32  ;;  %vm1476_vm5 = vmor %vm1474_vm4, %vm1475_vm15 }
 0xc8d   :  { %v1561_v7 = vsel %vm1558_vm6, %v1560_v4, %v1556_v5  ;;  %vm1479_vm6 = vcmp.eq.f32.partialorder %v1478_v27, 8.507059e+37  ;;  %v1765_v4 = vld [vmem:[#allocation14 + $0x18] sm:$0xff]  ;;  %v1764_v5 = vld [vmem:[#allocation14 + $0x10] sm:$0xff] }
 0xc8e   :  { %v1562_v10 = vmul.f32 %v2620_v8, %v1561_v7  ;;  %v1301_v8 = vmul.f32 %v1989_v12, %v1300_v16  ;;  %v1477_v53 = vsel %vm1476_vm5, %v1991_v40, %v1473_v43  ;;  %1788 = vmatpush.msra.mxu2 %v1765_v4  ;;  %v1762_v7 = vld [vmem:[#allocation14] sm:$0xff] }
 0xc8f   :  { %v1482_v59 = vsel %vm1479_vm6, %v1481_v57, %v1477_v53 }
 0xc90   :  { %1873 = vmatmul.msk.f32.vlgmr.msra.gmra.mxu0 %vm217_vm1, %v1562_v10  ;;  %v1302_v20 = vadd.f32 %v1989_v12, %v1301_v8  ;;  %v1483_v48 = vmul.f32 %v2612_v0, %v1482_v59  ;;  %1789 = vmatpush.msra.mxu2 %v1764_v5 }
 0xc92   :  { %v1306_v31 = vsel %vm2654_vm9, %v1989_v12, %v1302_v20 }
 0xc93   :  { %v1311_v39 = vsel %vm1308_vm12, %v1310_v34, %v1306_v31 }
 0xc94   :  { %v2646_v49 = vpop.xlane.xlu0 %1625  ;;  %v1312_v50 = vmul.f32 %v2584_v35, %v1311_v39 }
 0xc95   :  { %v1638_v60 = vand.u32 2147483648, %v2646_v49  ;;  %vm1632_vm8 = vweird.f32 %v2646_v49  ;;  %v1636_v35 = vand.u32 2147483647, %v2646_v49 }
 0xc97   :  { %v1639_v36 = vor.u32 1.1754944e-38, %v1638_v60 }
 0xc9b   :  { %v1257_v13 = vpop.f32.mrf.mxu0 }
 0xc9c   :  { %1419 = vrot.lane.b32.xlu2 %v1257_v13, %s2226_s17  ;;  %v1705_v14 = vpop.xlane.xlu0 %1704 }
 0xc9d   :  { %1992 = vrcp.f32 %v1705_v14  ;;  %v1717_v24 = vand.u32 2147483648, %v1705_v14  ;;  %v1715_v30 = vand.u32 2147483647, %v1705_v14  ;;  %vm1711_vm11 = vweird.f32 %v1705_v14 }
 0xc9e   :  { %1994 = vrcp.f32 %v2646_v49 }
 0xc9f   :  { %v1718_v15 = vor.u32 1.1754944e-38, %v1717_v24  ;;  %vm1716_vm14 = vcmp.eq.f32.partialorder %v1715_v30, 8.507059e+37 }
 0xca3   :  { %v1993_v18 = vpop.eup %1992  ;;  %v1178_v2 = vpop.f32.mrf.mxu1 }
 0xca4   :  { %v1707_v19 = vmul.f32 %v1993_v18, %v1705_v14  ;;  %v1995_v21 = vpop.eup %1994  ;;  %vm1712_vm10 = vweird.f32 %v1993_v18 }
 0xca5   :  { %v1628_v33 = vmul.f32 %v1995_v21, %v2646_v49  ;;  %vm1713_vm13 = vmor %vm1711_vm11, %vm1712_vm10  ;;  %vm1633_vm7 = vweird.f32 %v1995_v21  ;;  %vm1637_vm10 = vcmp.eq.f32.partialorder %v1636_v35, 8.507059e+37 }
 0xca6   :  { %v1708_v37 = vsub.f32 1.0, %v1707_v19  ;;  %vm1634_vm9 = vmor %vm1632_vm8, %vm1633_vm7  ;;  %v1925_v19 = vld [vmem:[%s2708_s12] ss:$0 sm:$0xff] }
 0xca7   :  { %v1629_v44 = vsub.f32 1.0, %v1628_v33 }
 0xca8   :  { %v1709_v29 = vmul.f32 %v1993_v18, %v1708_v37 }
 0xca9   :  { %v1630_v54 = vmul.f32 %v1995_v21, %v1629_v44 }
 0xcaa   :  { %v1710_v25 = vadd.f32 %v1993_v18, %v1709_v29 }
 0xcab   :  { %v1415_v38 = vpop.f32.mrf.mxu0 }
 0xcac   :  { %v1714_v41 = vsel %vm1713_vm13, %v1993_v18, %v1710_v25  ;;  %1427 = vrot.lane.b32.xlu1 %v1415_v38, %s2245_s2 }
 0xcad   :  { %v1719_v45 = vsel %vm1716_vm14, %v1718_v15, %v1714_v41 }
 0xcae   :  { %v1720_v47 = vmul.f32 %v2634_v52, %v1719_v45  ;;  %v1631_v52 = vadd.f32 %v1995_v21, %v1630_v54 }
 0xcaf   :  { %v1314_v6 = vpop.permute.xlu0 %1313 }
 0xcb0   :  { %1334 = vmatpush.msrb.mxu1 %v1314_v6  ;;  %1879 = vmatmul.msk.f32.vlgmr.msrb.gmra.mxu0 %vm217_vm1, %v1720_v47  ;;  %v1635_v61 = vsel %vm1634_vm9, %v1995_v21, %v1631_v52 }
 0xcb1   :  { %1864 = vmatmul.msk.f32.vlgmr.msrb.gmra.mxu1 %vm217_vm1, %v1312_v50  ;;  %v1640_v63 = vsel %vm1637_vm10, %v1639_v36, %v1635_v61 }
 0xcb2   :  { %1505 = vmatpush.msra.mxu1 %v1485_v28  ;;  %v1641_v1 = vmul.f32 %v2629_v42, %v1640_v63  ;;  %v1763_v42 = vld [vmem:[#allocation14 + $0x8] sm:$0xff] }
 0xcb3   :  { %1790 = vmatpush.msra.mxu2 %v1763_v42 }
 0xcb4   :  { %1663 = vmatpush.msrb.mxu1 %v1643_v58 }
 0xcb5   :  { %1791 = vmatpush.msra.mxu2 %v1762_v7 }
 0xcb9   :  { %1870 = vmatmul.msk.f32.vlgmr.msra.gmra.mxu1 %vm217_vm1, %v1483_v48 }
 0xcc1   :  { %1876 = vmatmul.msk.f32.vlgmr.msrb.gmra.mxu1 %vm217_vm1, %v1641_v1 }
 0xcf6   :  { %v1420_v10 = vpop.permute.xlu2 %1419 }
 0xcf7   :  { %v1430_v49 = vsel %vm217_vm1, %v1178_v2, %v1420_v10 }
 0xd0d   :  { %v1586_v56 = vpop.f32.mrf.mxu0 }
 0xd0e   :  { %1748 = vrot.lane.b32.xlu2 %v1586_v56, %s2226_s17 }
 0xd1e   :  { %v1428_v12 = vpop.permute.xlu1 %1427 }
 0xd2d   :  { %v1744_v55 = vpop.f32.mrf.mxu0 }
 0xd2e   :  { %v1336_v3 = vpop.f32.mrf.mxu1  ;;  %1756 = vrot.lane.b32.xlu1 %v1744_v55, %s2245_s2 }
 0xd2f   :  { %1423 = vrot.lane.b32.xlu0 %v1336_v3, %s2246_s20 }
 0xd36   :  { %v1507_v0 = vpop.f32.mrf.mxu1 }
 0xd3e   :  { %v1665_v51 = vpop.f32.mrf.mxu1 }
 0xd3f   :  { %1752 = vrot.lane.b32.xlu0 %v1665_v51, %s2246_s20 }
 0xd68   :  { %v1749_v14 = vpop.permute.xlu2 %1748 }
 0xd69   :  { %v1759_v16 = vsel %vm217_vm1, %v1507_v0, %v1749_v14 }
 0xda0   :  { %v1757_v8 = vpop.permute.xlu1 %1756 }
 0xda1   :  { %v1424_v11 = vpop.permute.xlu0 %1423 }
 0xda2   :  { %v1431_v9 = vsel %vm543_vm2, %v1430_v49, %v1424_v11 }
 0xda3   :  { %v1432_v13 = vsel %vm545_vm3, %v1431_v9, %v1428_v12 }
 0xda4   :  { %1880 = vmatmul.msk.f32.vlgmr.msra.gmra.mxu2 %vm184_vm0, %v1432_v13 }
 0xdb1   :  { %v1753_v40 = vpop.permute.xlu0 %1752 }
 0xdb2   :  { %v1760_v17 = vsel %vm543_vm2, %v1759_v16, %v1753_v40 }
 0xdb3   :  { %v1761_v18 = vsel %vm545_vm3, %v1760_v17, %v1757_v8 }
 0xdb4   :  { %1881 = vmatmul.msk.f32.gmra.mxu2 %vm184_vm0, %v1761_v18 }
 0xe27   :  { %v1793_v20 = vpop.f32.mrf.mxu2 }
 0xe28   :  { %v1794_v62 = vadd.f32 %v1925_v19, %v1793_v20 }
 0xe2a   :  { %1799 = vst.msk [vmem:[#allocation16] sm:$0xff] %vm184_vm0, %v1794_v62 }
 0xe37   :  { %v1796_v21 = vpop.f32.mrf.mxu2 }
 0xe38   :  { %v1797_v22 = vadd.f32 %v1925_v19, %v1796_v21 }
 0xe3a   :  { %1800 = vst.msk [vmem:[#allocation16 + $0x8] sm:$0xff] %vm184_vm0, %v1797_v22 }
 0xe3b   :  { %1813 = dma.vmem_to_hbm [thread:$0]  %s1806_s29, 256, %s1808_s15, [#allocation4], %s2225_s16, %s2225_s16, %s2226_s17  }
 0xe3c   :  { %2222 = dma.done.wait [#allocation4], 256  }
 0xe3d   :  { %2223 = vsyncadd [#allocation4], 4294967040 }
 0xe3e   :  { %1818 = vsyncpa [#allocation3], 1 }
 0xe3f   :  { %1819 = vsyncpa [#allocation6], 1 }
 0xe40   :  { %1820 = vsyncpa [#allocation9], 1 }
 0xe41   :  { %1821 = vsyncpa [#allocation12], 1 }
 0xe42   :  { %1822 = vsyncpa [#allocation15], 1 }
 0xe43   :  { %1823 = vsyncpa [#allocation4], 1 }

</bundles_post_ra>
